<compile_context>
chip_gen: v7x
topology: tpu7x:2x2x1
jax: 0.10.0
libtpu: 0.0.40
codegen_flags: <defaults>
</compile_context>

<pallas_src>
import numpy as np
import jax
import jax.numpy as jnp
from jax.experimental import pallas as pl
from jax.experimental.pallas import tpu as pltpu


def _silu_kernel(x):
    # x * sigmoid(x): exp and reciprocal both on the EUP slot (no VALU divide).
    return x * pl.reciprocal(1.0 + jnp.exp(-x), approx=True)


def _silu_ref(x):
    return x * (1.0 / (1.0 + jnp.exp(-x)))


def egnn_kernel(
        # edge-tiled inputs (streamed, double-buffered)
        scat_ref,   # [TE, 2N] bf16  [one_hot(row) | one_hot(col)]  (gather)
        srT_ref,    # [N, TE]  bf16  one_hot(row)^T                 (scatter)
        zb_ref,     # [TE, D]  f32   rel_dist * W_dist + b_edge1    (precomputed)
        spin_ref,   # [TE, 3]  f32   rel_dist*[cos2t, sin2t, phi] / deg[row]
        # resident inputs (weights bf16, biases f32)
        h0_ref, wemb_ref, bemb_ref,
        we1r_ref, we1c_ref, we2_ref, be2_ref,
        wn1_ref, bn1_ref, wn2_ref, bn2_ref,
        ww1_ref, bw1_ref, ww2_ref, bw2_ref,
        # output: v_latent packed [N, 3D] (spin-major columns), resident accumulator
        vlat_ref,
        # persistent VMEM scratch
        h_scr,      # [N, D]  f32   node features
        hp_scr,     # [2N, D] bf16  stacked projection [h@We1_row ; h@We1_col]
        agg_scr):   # [N, D]  f32   scatter-sum accumulator
    f32, bf16 = jnp.float32, jnp.bfloat16
    dot = lambda a, b: jnp.dot(a, b, preferred_element_type=f32)

    l = pl.program_id(0)
    e = pl.program_id(1)
    nl = pl.num_programs(0)
    ne = pl.num_programs(1)
    last_layer = l == nl - 1
    not_last = jnp.logical_not(last_layer)

    # ---- once, at the very first grid step: node embedding ----
    @pl.when((l == 0) & (e == 0))
    def _init():
        h_scr[...] = dot(h0_ref[...], wemb_ref[...]) + bemb_ref[...]

    # ---- per layer, first edge tile: reset agg; project h once (reassociated gather) ----
    @pl.when(e == 0)
    def _layer_start():
        agg_scr[...] = jnp.zeros_like(agg_scr)
        h_bf = h_scr[...].astype(bf16)
        hp_r = dot(h_bf, we1r_ref[...])                      # [N, D]
        hp_c = dot(h_bf, we1c_ref[...])                      # [N, D]
        hp_scr[...] = jnp.concatenate([hp_r, hp_c], axis=0).astype(bf16)

    @pl.when(last_layer & (e == 0))
    def _vlat_init():
        vlat_ref[...] = jnp.zeros_like(vlat_ref)

    # ---- every edge tile: fused gather (single K=2N MXU pass) + edge MLP ----
    z = dot(scat_ref[...], hp_scr[...]) + zb_ref[...]                       # [TE, D]
    ef = dot(_silu_kernel(z).astype(bf16), we2_ref[...]) + be2_ref[...]     # [TE, D]

    # scatter-sum of edge features (only needed when a node update follows)
    @pl.when(not_last)
    def _aggregate():
        agg_scr[...] += dot(srT_ref[...], ef.astype(bf16))

    # last layer: weighting MLP + fused 3-spin scatter-mean (1/deg folded into spin_ref)
    @pl.when(last_layer)
    def _weighting():
        spin = spin_ref[...]
        wgt = dot(_silu_kernel(dot(ef.astype(bf16), ww1_ref[...]) + bw1_ref[...]).astype(bf16),
                  ww2_ref[...]) + bw2_ref[...]                              # [TE, D]
        ws = jnp.concatenate([wgt * spin[:, 0:1], wgt * spin[:, 1:2], wgt * spin[:, 2:3]],
                             axis=1).astype(bf16)                           # [TE, 3D]
        vlat_ref[...] += dot(srT_ref[...], ws)

    # ---- end of layer (except the last): node MLP (fused K=2D first layer) + residual ----
    @pl.when((e == ne - 1) & not_last)
    def _node_update():
        hn = jnp.concatenate([h_scr[...].astype(bf16), agg_scr[...].astype(bf16)], axis=1)
        u = dot(hn, wn1_ref[...]) + bn1_ref[...]
        h_scr[...] = h_scr[...] + dot(_silu_kernel(u).astype(bf16), wn2_ref[...]) + bn2_ref[...]


def init_params(key, num_properties, hidden_dim):
    """PyTorch-default-style Linear init (uniform +-1/sqrt(fan_in)), deterministic."""
    D = hidden_dim

    def lin(k, fin, fout):
        kw, kb = jax.random.split(k)
        s = 1.0 / np.sqrt(fin)
        w = jax.random.uniform(kw, (fin, fout), jnp.float32, -s, s)
        b = jax.random.uniform(kb, (fout,), jnp.float32, -s, s)
        return w, b

    ks = jax.random.split(key, 7)
    p = {}
    p['emb_w'], p['emb_b'] = lin(ks[0], num_properties, D)
    p['edge_w1'], p['edge_b1'] = lin(ks[1], 2 * D + 1, D)
    p['edge_w2'], p['edge_b2'] = lin(ks[2], D, D)
    p['node_w1'], p['node_b1'] = lin(ks[3], 2 * D, D)
    p['node_w2'], p['node_b2'] = lin(ks[4], D, D)
    p['wt_w1'], p['wt_b1'] = lin(ks[5], D, D)
    p['wt_w2'], p['wt_b2'] = lin(ks[6], D, D)
    return p


def egnn_forward(params, h, x, edge_index, num_layers, hidden_dim, *, edge_tile=512):
    """Pallas-backed EGNN forward. Returns (v_latent [N,D,3], x [N,3], v [N,2])."""
    assert num_layers >= 1, "Number of layers must be greater than 0."
    N, P = h.shape
    E = edge_index.shape[1]
    D = hidden_dim
    f32, bf16 = jnp.float32, jnp.bfloat16
    row, col = edge_index[0], edge_index[1]
    lane = 128

    # ---- generation-aware VMEM capacity (64 MiB v7x, 128 MiB v5e/v6e) ----
    try:
        vmem_cap = int(getattr(pltpu.get_tpu_info(), "vmem_capacity_bytes", 64 << 20))
    except Exception:
        vmem_cap = 64 << 20

    # ---- glue: geometric edge features ----
    rel_pos = x[row] - x[col]                                               # [E, 3]
    rel_dist = jnp.sqrt(jnp.sum(rel_pos ** 2, axis=-1, keepdims=True))      # [E, 1]
    theta = jnp.arctan2(rel_pos[:, 1], rel_pos[:, 0])
    phi = jnp.arctan2(rel_pos[:, 2], jnp.sqrt(rel_pos[:, 0] ** 2 + rel_pos[:, 1] ** 2))
    spin2 = rel_dist * jnp.stack([jnp.cos(2 * theta), jnp.sin(2 * theta), phi], axis=1)

    deg = jnp.zeros((N,), f32).at[row].add(1.0)
    inv_deg = 1.0 / jnp.maximum(deg, 1.0)
    spin_scaled = (spin2 * inv_deg[row][:, None]).astype(f32)   # fold scatter-mean into per-edge scale

    # loop-invariant first-layer edge-MLP term, computed once in glue
    we1 = params['edge_w1']                                     # [2D+1, D]
    we1r, we1c, we1d = we1[:D], we1[D:2 * D], we1[2 * D:2 * D + 1]
    z_base = (rel_dist * we1d + params['edge_b1'][None, :]).astype(f32)     # [E, D]

    # one-hot gather ([E, 2N], block layout row|col) + transposed scatter ([N, E]) -- exact in bf16
    s_row = jax.nn.one_hot(row, N, dtype=bf16)
    s_col = jax.nn.one_hot(col, N, dtype=bf16)
    s_cat = jnp.concatenate([s_row, s_col], axis=1)             # [E, 2N]
    s_rowT = s_row.T                                            # [N, E]

    # ---- edge tiling (tile size capped so double-buffered streams stay within ~1/4 of VMEM) ----
    bytes_per_edge = 2 * (2 * N * 2 + N * 2 + max(D, lane) * 4 + lane * 4)
    te_cap = max(lane, ((vmem_cap - (8 << 20)) // 4 // bytes_per_edge) // lane * lane)
    edge_tile = min(edge_tile, te_cap)
    if E <= edge_tile:
        TE, E_pad = E, E
    else:
        TE = max(lane, (edge_tile // lane) * lane)              # multiple of 128 when tiling
        E_pad = -(-E // TE) * TE
    pe = E_pad - E
    if pe:   # padded edges: zero one-hots / zero spin -> contribute nothing
        s_cat = jnp.pad(s_cat, ((0, pe), (0, 0)))
        s_rowT = jnp.pad(s_rowT, ((0, 0), (0, pe)))
        z_base = jnp.pad(z_base, ((0, pe), (0, 0)))
        spin_scaled = jnp.pad(spin_scaled, ((0, pe), (0, 0)))
    ne = E_pad // TE

    def b2(v):   # biases as [1, D] rows
        return v[None, :].astype(f32)

    inputs = (
        s_cat, s_rowT, z_base, spin_scaled,
        h.astype(bf16),
        params['emb_w'].astype(bf16), b2(params['emb_b']),
        we1r.astype(bf16), we1c.astype(bf16),
        params['edge_w2'].astype(bf16), b2(params['edge_b2']),
        params['node_w1'].astype(bf16), b2(params['node_b1']),    # fused [2D, D] first layer
        params['node_w2'].astype(bf16), b2(params['node_b2']),
        params['wt_w1'].astype(bf16), b2(params['wt_b1']),
        params['wt_w2'].astype(bf16), b2(params['wt_b2']),
    )

    edge_specs = [
        pl.BlockSpec((TE, 2 * N), lambda l, e: (e, 0)),
        pl.BlockSpec((N, TE), lambda l, e: (0, e)),
        pl.BlockSpec((TE, D), lambda l, e: (e, 0)),
        pl.BlockSpec((TE, 3), lambda l, e: (e, 0)),
    ]
    resident_specs = [pl.BlockSpec(a.shape, lambda l, e: (0, 0)) for a in inputs[4:]]

    grid_spec = pltpu.PrefetchScalarGridSpec(
        num_scalar_prefetch=0,
        grid=(num_layers, ne),
        in_specs=edge_specs + resident_specs,
        out_specs=pl.BlockSpec((N, 3 * D), lambda l, e: (0, 0)),
        scratch_shapes=[
            pltpu.VMEM((N, D), f32),          # h
            pltpu.VMEM((2 * N, D), bf16),     # stacked projection for the fused gather
            pltpu.VMEM((N, D), f32),          # agg accumulator
        ],
    )

    # ---- VMEM limit: per-tile working set, clamped to (capacity - 8 MiB headroom) ----
    d_pad = max(D, lane)
    tile_in_bytes = TE * bytes_per_edge
    weights_bytes = (P * D + 9 * D * D) * 2 + 10 * d_pad * 4
    persist_bytes = (N * max(P, lane) * 2 + 2 * N * 3 * d_pad * 4
                     + 2 * N * d_pad * 4 + 2 * N * d_pad * 2)
    temps_bytes = 8 * TE * max(3 * D, lane) * 4
    work = tile_in_bytes + weights_bytes + persist_bytes + temps_bytes
    vmem_limit = int(min(max(2 * work, 32 << 20), vmem_cap - (8 << 20)))

    flops = int(
        num_layers * (4 * E_pad * N * D + 2 * E_pad * D * D + 4 * N * D * D)
        + (num_layers - 1) * (2 * E_pad * N * D + 6 * N * D * D)
        + 4 * E_pad * D * D + 6 * E_pad * N * D + 2 * N * P * D)
    transc = int(num_layers * E_pad * D + (num_layers - 1) * N * D + E_pad * D)
    bytes_acc = int(
        num_layers * E_pad * (2 * N * 2 + N * 2 + D * 4 + 3 * 4)
        + (P * D + 9 * D * D) * 2 + 9 * D * 4 + N * P * 2 + N * 3 * D * 4)
    cost = pl.CostEstimate(flops=flops, transcendentals=transc, bytes_accessed=bytes_acc)

    vlat_packed = pl.pallas_call(
        egnn_kernel,
        out_shape=jax.ShapeDtypeStruct((N, 3 * D), f32),
        grid_spec=grid_spec,
        compiler_params=pltpu.CompilerParams(
            dimension_semantics=("arbitrary", "arbitrary"),
            vmem_limit_bytes=vmem_limit),
        cost_estimate=cost,
    )(*inputs)

    # ---- glue: match PyTorch output layout + tiny final normalize ----
    v_latent = jnp.transpose(vlat_packed.reshape(N, 3, D), (0, 2, 1))       # [N, D, 3]
    v = v_latent[:, 0, :2]                                                  # [N, 2]
    v = v / jnp.maximum(jnp.linalg.norm(v, axis=-1, keepdims=True), 1e-12)
    return v_latent, x, v


def egnn_reference(params, h, x, edge_index, num_layers, hidden_dim):
    """Pure-JAX f32 reference mirroring the PyTorch forward (for verification)."""
    N = h.shape[0]
    row, col = edge_index[0], edge_index[1]

    def mlp(z, w1, b1, w2, b2):
        z = _silu_ref(z @ w1 + b1)
        return z @ w2 + b2

    h_ = h @ params['emb_w'] + params['emb_b']
    rel_pos = x[row] - x[col]
    rel_dist = jnp.sqrt(jnp.sum(rel_pos ** 2, axis=-1, keepdims=True))
    theta = jnp.arctan2(rel_pos[:, 1], rel_pos[:, 0])
    phi = jnp.arctan2(rel_pos[:, 2], jnp.sqrt(rel_pos[:, 0] ** 2 + rel_pos[:, 1] ** 2))
    spin2 = rel_dist * jnp.stack([jnp.cos(2 * theta), jnp.sin(2 * theta), phi], axis=1)

    ef = None
    for _ in range(num_layers):
        e_in = jnp.concatenate([h_[row], h_[col], rel_dist], axis=-1)
        ef = mlp(e_in, params['edge_w1'], params['edge_b1'],
                 params['edge_w2'], params['edge_b2'])
        agg = jnp.zeros((N, ef.shape[-1]), ef.dtype).at[row].add(ef)
        n_in = jnp.concatenate([h_, agg], axis=-1)
        h_ = h_ + mlp(n_in, params['node_w1'], params['node_b1'],
                      params['node_w2'], params['node_b2'])

    w = mlp(ef, params['wt_w1'], params['wt_b1'], params['wt_w2'], params['wt_b2'])
    rel_scaled = spin2[:, None, :] * w[:, :, None]               # [E, D, 3]
    sums = jnp.zeros((N,) + rel_scaled.shape[1:], rel_scaled.dtype).at[row].add(rel_scaled)
    cnt = jnp.zeros((N,), jnp.float32).at[row].add(1.0)
    v_latent = sums / jnp.maximum(cnt, 1.0)[:, None, None]
    v = v_latent[:, 0, :2]
    v = v / jnp.maximum(jnp.linalg.norm(v, axis=-1, keepdims=True), 1e-12)
    return v_latent, x, v


if __name__ == "__main__":
    # D a multiple of 128 -> lane-dense matmuls and a lane-dense [N, 3D] output store.
    num_properties, num_layers, hidden_dim = 4, 2, 128
    N, E = 16, 256

    key = jax.random.PRNGKey(0)
    kp, kh, kx, ke = jax.random.split(key, 4)
    params = init_params(kp, num_properties, hidden_dim)
    h = jax.random.normal(kh, (N, num_properties), jnp.float32)
    x = jax.random.normal(kx, (N, 3), jnp.float32)
    edge_index = jax.random.randint(ke, (2, E), 0, N, dtype=jnp.int32)

    # edge_tile=128 -> grid (num_layers=2, edge_tiles=2) exercises the tiled pipeline.
    v_latent, x_out, v = egnn_forward(params, h, x, edge_index, num_layers, hidden_dim,
                                      edge_tile=128)
    jax.block_until_ready((v_latent, x_out, v))

    # sanity check against a pure-JAX f32 reference.  Loose tolerance: the kernel
    # runs every matmul on the MXU with bf16 operands across num_layers layers;
    # structural bugs (wrong gather/scatter/layout) give O(1) errors, not a few %.
    vl_ref, x_ref, v_ref = egnn_reference(params, h, x, edge_index, num_layers, hidden_dim)
    vl_np, vl_ref_np = np.asarray(v_latent), np.asarray(vl_ref)
    rel_err = np.max(np.abs(vl_np - vl_ref_np)) / (np.max(np.abs(vl_ref_np)) + 1e-9)
    assert vl_np.shape == (N, hidden_dim, 3) and v.shape == (N, 2)
    assert np.allclose(np.asarray(x_out), np.asarray(x_ref))
    assert rel_err < 5e-2, f"v_latent mismatch, rel_err={rel_err}"

    print("KERNEL_OK")
</pallas_src>

<mosaic_0001>
module attributes {stable_mosaic.version = 11 : i64} {
  func.func @egnn_kernel(%arg0: i32, %arg1: i32, %arg2: memref<128x32xbf16, #tpu.memory_space<vmem>>, %arg3: memref<16x128xbf16, #tpu.memory_space<vmem>>, %arg4: memref<128x128xf32, #tpu.memory_space<vmem>>, %arg5: memref<128x3xf32, #tpu.memory_space<vmem>>, %arg6: memref<16x4xbf16, #tpu.memory_space<vmem>>, %arg7: memref<4x128xbf16, #tpu.memory_space<vmem>>, %arg8: memref<1x128xf32, #tpu.memory_space<vmem>>, %arg9: memref<128x128xbf16, #tpu.memory_space<vmem>>, %arg10: memref<128x128xbf16, #tpu.memory_space<vmem>>, %arg11: memref<128x128xbf16, #tpu.memory_space<vmem>>, %arg12: memref<1x128xf32, #tpu.memory_space<vmem>>, %arg13: memref<256x128xbf16, #tpu.memory_space<vmem>>, %arg14: memref<1x128xf32, #tpu.memory_space<vmem>>, %arg15: memref<128x128xbf16, #tpu.memory_space<vmem>>, %arg16: memref<1x128xf32, #tpu.memory_space<vmem>>, %arg17: memref<128x128xbf16, #tpu.memory_space<vmem>>, %arg18: memref<1x128xf32, #tpu.memory_space<vmem>>, %arg19: memref<128x128xbf16, #tpu.memory_space<vmem>>, %arg20: memref<1x128xf32, #tpu.memory_space<vmem>>, %arg21: memref<16x384xf32, #tpu.memory_space<vmem>>, %arg22: memref<16x128xf32, #tpu.memory_space<vmem>>, %arg23: memref<32x128xbf16, #tpu.memory_space<vmem>>, %arg24: memref<16x128xf32, #tpu.memory_space<vmem>>) attributes {dimension_semantics = [#tpu.dimension_semantics<arbitrary>, #tpu.dimension_semantics<arbitrary>], iteration_bounds = array<i64: 2, 2>, scalar_prefetch = 0 : i64, scratch_operands = 3 : i64, tpu.core_type = #tpu.core_type<tc>, window_params = [{transform_indices = @transform_0, window_bounds = array<i64: 128, 32>}, {transform_indices = @transform_1, window_bounds = array<i64: 16, 128>}, {transform_indices = @transform_2, window_bounds = array<i64: 128, 128>}, {transform_indices = @transform_3, window_bounds = array<i64: 128, 3>}, {pipeline_mode = #tpu.pipeline_mode<synchronous>, transform_indices = @transform_4, window_bounds = array<i64: 16, 4>}, {pipeline_mode = #tpu.pipeline_mode<synchronous>, transform_indices = @transform_5, window_bounds = array<i64: 4, 128>}, {pipeline_mode = #tpu.pipeline_mode<synchronous>, transform_indices = @transform_6, window_bounds = array<i64: 1, 128>}, {pipeline_mode = #tpu.pipeline_mode<synchronous>, transform_indices = @transform_7, window_bounds = array<i64: 128, 128>}, {pipeline_mode = #tpu.pipeline_mode<synchronous>, transform_indices = @transform_8, window_bounds = array<i64: 128, 128>}, {pipeline_mode = #tpu.pipeline_mode<synchronous>, transform_indices = @transform_9, window_bounds = array<i64: 128, 128>}, {pipeline_mode = #tpu.pipeline_mode<synchronous>, transform_indices = @transform_10, window_bounds = array<i64: 1, 128>}, {pipeline_mode = #tpu.pipeline_mode<synchronous>, transform_indices = @transform_11, window_bounds = array<i64: 256, 128>}, {pipeline_mode = #tpu.pipeline_mode<synchronous>, transform_indices = @transform_12, window_bounds = array<i64: 1, 128>}, {pipeline_mode = #tpu.pipeline_mode<synchronous>, transform_indices = @transform_13, window_bounds = array<i64: 128, 128>}, {pipeline_mode = #tpu.pipeline_mode<synchronous>, transform_indices = @transform_14, window_bounds = array<i64: 1, 128>}, {pipeline_mode = #tpu.pipeline_mode<synchronous>, transform_indices = @transform_15, window_bounds = array<i64: 128, 128>}, {pipeline_mode = #tpu.pipeline_mode<synchronous>, transform_indices = @transform_16, window_bounds = array<i64: 1, 128>}, {pipeline_mode = #tpu.pipeline_mode<synchronous>, transform_indices = @transform_17, window_bounds = array<i64: 128, 128>}, {pipeline_mode = #tpu.pipeline_mode<synchronous>, transform_indices = @transform_18, window_bounds = array<i64: 1, 128>}, {pipeline_mode = #tpu.pipeline_mode<synchronous>, transform_indices = @transform_19, window_bounds = array<i64: 16, 384>}]} {
    %c1_i32 = arith.constant 1 : i32
    %0 = arith.cmpi eq, %arg0, %c1_i32 : i32
    %true = arith.constant true
    %1 = arith.xori %0, %true : i1
    %c0_i32 = arith.constant 0 : i32
    %2 = arith.cmpi eq, %arg0, %c0_i32 : i32
    %c0_i32_0 = arith.constant 0 : i32
    %3 = arith.cmpi eq, %arg1, %c0_i32_0 : i32
    %4 = arith.andi %2, %3 : i1
    %5 = arith.extui %4 : i1 to i32
    %c0_i32_1 = arith.constant 0 : i32
    %6 = arith.cmpi ne, %5, %c0_i32_1 : i32
    scf.if %6 {
      %c0_22 = arith.constant 0 : index
      %c0_23 = arith.constant 0 : index
      %40 = vector.load %arg6[%c0_22, %c0_23] : memref<16x4xbf16, #tpu.memory_space<vmem>>, vector<16x4xbf16>
      %c0_24 = arith.constant 0 : index
      %c0_25 = arith.constant 0 : index
      %41 = vector.load %arg7[%c0_24, %c0_25] : memref<4x128xbf16, #tpu.memory_space<vmem>>, vector<4x128xbf16>
      %cst_26 = arith.constant dense<0.000000e+00> : vector<16x128xf32>
      %42 = tpu.matmul %40, %41, %cst_26 {dimension_numbers = #tpu.dot_dimension_numbers<[1], [0], [0], [1], [0, 0, 1, 1], [], []>} : vector<16x4xbf16>, vector<4x128xbf16>, vector<16x128xf32> -> vector<16x128xf32>
      %c0_27 = arith.constant 0 : index
      %c0_28 = arith.constant 0 : index
      %43 = vector.load %arg8[%c0_27, %c0_28] : memref<1x128xf32, #tpu.memory_space<vmem>>, vector<1x128xf32>
      %44 = vector.broadcast %43 : vector<1x128xf32> to vector<16x128xf32>
      %45 = arith.addf %42, %44 : vector<16x128xf32>
      %c0_29 = arith.constant 0 : index
      %c0_30 = arith.constant 0 : index
      %46 = vector.load %arg22[%c0_29, %c0_30] : memref<16x128xf32, #tpu.memory_space<vmem>>, vector<16x128xf32>
      tpu.vector_store %arg22[%c0_29, %c0_30], %45 {strides = array<i32>} : memref<16x128xf32, #tpu.memory_space<vmem>>, vector<16x128xf32>,
    } else {
    }
    %c0_i32_2 = arith.constant 0 : i32
    %7 = arith.cmpi eq, %arg1, %c0_i32_2 : i32
    %8 = arith.extui %7 : i1 to i32
    %c0_i32_3 = arith.constant 0 : i32
    %9 = arith.cmpi ne, %8, %c0_i32_3 : i32
    scf.if %9 {
      %cst_22 = arith.constant 0.000000e+00 : f32
      %40 = vector.broadcast %cst_22 : f32 to vector<16x128xf32>
      %c0_23 = arith.constant 0 : index
      %c0_24 = arith.constant 0 : index
      %41 = vector.load %arg24[%c0_23, %c0_24] : memref<16x128xf32, #tpu.memory_space<vmem>>, vector<16x128xf32>
      tpu.vector_store %arg24[%c0_23, %c0_24], %40 {strides = array<i32>} : memref<16x128xf32, #tpu.memory_space<vmem>>, vector<16x128xf32>,
      %c0_25 = arith.constant 0 : index
      %c0_26 = arith.constant 0 : index
      %42 = vector.load %arg22[%c0_25, %c0_26] : memref<16x128xf32, #tpu.memory_space<vmem>>, vector<16x128xf32>
      %43 = arith.truncf %42 : vector<16x128xf32> to vector<16x128xbf16>
      %c0_27 = arith.constant 0 : index
      %c0_28 = arith.constant 0 : index
      %44 = vector.load %arg9[%c0_27, %c0_28] : memref<128x128xbf16, #tpu.memory_space<vmem>>, vector<128x128xbf16>
      %cst_29 = arith.constant dense<0.000000e+00> : vector<16x128xf32>
      %45 = tpu.matmul %43, %44, %cst_29 {dimension_numbers = #tpu.dot_dimension_numbers<[1], [0], [0], [1], [0, 0, 1, 1], [], []>} : vector<16x128xbf16>, vector<128x128xbf16>, vector<16x128xf32> -> vector<16x128xf32>
      %c0_30 = arith.constant 0 : index
      %c0_31 = arith.constant 0 : index
      %46 = vector.load %arg10[%c0_30, %c0_31] : memref<128x128xbf16, #tpu.memory_space<vmem>>, vector<128x128xbf16>
      %cst_32 = arith.constant dense<0.000000e+00> : vector<16x128xf32>
      %47 = tpu.matmul %43, %46, %cst_32 {dimension_numbers = #tpu.dot_dimension_numbers<[1], [0], [0], [1], [0, 0, 1, 1], [], []>} : vector<16x128xbf16>, vector<128x128xbf16>, vector<16x128xf32> -> vector<16x128xf32>
      %48 = tpu.concatenate %45, %47 in 0 : vector<16x128xf32>, vector<16x128xf32> -> vector<32x128xf32>
      %49 = arith.truncf %48 : vector<32x128xf32> to vector<32x128xbf16>
      %c0_33 = arith.constant 0 : index
      %c0_34 = arith.constant 0 : index
      %50 = vector.load %arg23[%c0_33, %c0_34] : memref<32x128xbf16, #tpu.memory_space<vmem>>, vector<32x128xbf16>
      tpu.vector_store %arg23[%c0_33, %c0_34], %49 {strides = array<i32>} : memref<32x128xbf16, #tpu.memory_space<vmem>>, vector<32x128xbf16>,
    } else {
    }
    %c0_i32_4 = arith.constant 0 : i32
    %10 = arith.cmpi eq, %arg1, %c0_i32_4 : i32
    %11 = arith.andi %0, %10 : i1
    %12 = arith.extui %11 : i1 to i32
    %c0_i32_5 = arith.constant 0 : i32
    %13 = arith.cmpi ne, %12, %c0_i32_5 : i32
    scf.if %13 {
      %cst_22 = arith.constant 0.000000e+00 : f32
      %40 = vector.broadcast %cst_22 : f32 to vector<16x384xf32>
      %c0_23 = arith.constant 0 : index
      %c0_24 = arith.constant 0 : index
      %41 = vector.load %arg21[%c0_23, %c0_24] : memref<16x384xf32, #tpu.memory_space<vmem>>, vector<16x384xf32>
      tpu.vector_store %arg21[%c0_23, %c0_24], %40 {strides = array<i32>} : memref<16x384xf32, #tpu.memory_space<vmem>>, vector<16x384xf32>,
    } else {
    }
    %c0 = arith.constant 0 : index
    %c0_6 = arith.constant 0 : index
    %14 = vector.load %arg2[%c0, %c0_6] : memref<128x32xbf16, #tpu.memory_space<vmem>>, vector<128x32xbf16>
    %c0_7 = arith.constant 0 : index
    %c0_8 = arith.constant 0 : index
    %15 = vector.load %arg23[%c0_7, %c0_8] : memref<32x128xbf16, #tpu.memory_space<vmem>>, vector<32x128xbf16>
    %cst = arith.constant dense<0.000000e+00> : vector<128x128xf32>
    %16 = tpu.matmul %14, %15, %cst {dimension_numbers = #tpu.dot_dimension_numbers<[1], [0], [0], [1], [0, 0, 1, 1], [], []>} : vector<128x32xbf16>, vector<32x128xbf16>, vector<128x128xf32> -> vector<128x128xf32>
    %c0_9 = arith.constant 0 : index
    %c0_10 = arith.constant 0 : index
    %17 = vector.load %arg4[%c0_9, %c0_10] : memref<128x128xf32, #tpu.memory_space<vmem>>, vector<128x128xf32>
    %18 = arith.addf %16, %17 : vector<128x128xf32>
    %cst_11 = arith.constant 0.000000e+00 : f32
    %19 = vector.broadcast %cst_11 : f32 to vector<128x128xf32>
    %20 = arith.subf %19, %18 : vector<128x128xf32>
    %21 = math.exp %20 : vector<128x128xf32>
    %cst_12 = arith.constant 1.000000e+00 : f32
    %22 = vector.broadcast %cst_12 : f32 to vector<128x128xf32>
    %23 = arith.addf %22, %21 : vector<128x128xf32>
    %24 = tpu.reciprocal %23 {approx = true} : vector<128x128xf32> -> vector<128x128xf32>
    %25 = arith.mulf %18, %24 : vector<128x128xf32>
    %26 = arith.truncf %25 : vector<128x128xf32> to vector<128x128xbf16>
    %c0_13 = arith.constant 0 : index
    %c0_14 = arith.constant 0 : index
    %27 = vector.load %arg11[%c0_13, %c0_14] : memref<128x128xbf16, #tpu.memory_space<vmem>>, vector<128x128xbf16>
    %cst_15 = arith.constant dense<0.000000e+00> : vector<128x128xf32>
    %28 = tpu.matmul %26, %27, %cst_15 {dimension_numbers = #tpu.dot_dimension_numbers<[1], [0], [0], [1], [0, 0, 1, 1], [], []>} : vector<128x128xbf16>, vector<128x128xbf16>, vector<128x128xf32> -> vector<128x128xf32>
    %c0_16 = arith.constant 0 : index
    %c0_17 = arith.constant 0 : index
    %29 = vector.load %arg12[%c0_16, %c0_17] : memref<1x128xf32, #tpu.memory_space<vmem>>, vector<1x128xf32>
    %30 = vector.broadcast %29 : vector<1x128xf32> to vector<128x128xf32>
    %31 = arith.addf %28, %30 : vector<128x128xf32>
    %32 = arith.extui %1 : i1 to i32
    %c0_i32_18 = arith.constant 0 : i32
    %33 = arith.cmpi ne, %32, %c0_i32_18 : i32
    scf.if %33 {
      %c0_22 = arith.constant 0 : index
      %c0_23 = arith.constant 0 : index
      %40 = vector.load %arg24[%c0_22, %c0_23] : memref<16x128xf32, #tpu.memory_space<vmem>>, vector<16x128xf32>
      %c0_24 = arith.constant 0 : index
      %c0_25 = arith.constant 0 : index
      %41 = vector.load %arg3[%c0_24, %c0_25] : memref<16x128xbf16, #tpu.memory_space<vmem>>, vector<16x128xbf16>
      %42 = arith.truncf %31 : vector<128x128xf32> to vector<128x128xbf16>
      %cst_26 = arith.constant dense<0.000000e+00> : vector<16x128xf32>
      %43 = tpu.matmul %41, %42, %cst_26 {dimension_numbers = #tpu.dot_dimension_numbers<[1], [0], [0], [1], [0, 0, 1, 1], [], []>} : vector<16x128xbf16>, vector<128x128xbf16>, vector<16x128xf32> -> vector<16x128xf32>
      %44 = arith.addf %40, %43 : vector<16x128xf32>
      %c0_27 = arith.constant 0 : index
      %c0_28 = arith.constant 0 : index
      %45 = vector.load %arg24[%c0_27, %c0_28] : memref<16x128xf32, #tpu.memory_space<vmem>>, vector<16x128xf32>
      tpu.vector_store %arg24[%c0_27, %c0_28], %44 {strides = array<i32>} : memref<16x128xf32, #tpu.memory_space<vmem>>, vector<16x128xf32>,
    } else {
    }
    %34 = arith.extui %0 : i1 to i32
    %c0_i32_19 = arith.constant 0 : i32
    %35 = arith.cmpi ne, %34, %c0_i32_19 : i32
    scf.if %35 {
      %c0_22 = arith.constant 0 : index
      %c0_23 = arith.constant 0 : index
      %40 = vector.load %arg5[%c0_22, %c0_23] : memref<128x3xf32, #tpu.memory_space<vmem>>, vector<128x3xf32>
      %41 = arith.truncf %31 : vector<128x128xf32> to vector<128x128xbf16>
      %c0_24 = arith.constant 0 : index
      %c0_25 = arith.constant 0 : index
      %42 = vector.load %arg17[%c0_24, %c0_25] : memref<128x128xbf16, #tpu.memory_space<vmem>>, vector<128x128xbf16>
      %cst_26 = arith.constant dense<0.000000e+00> : vector<128x128xf32>
      %43 = tpu.matmul %41, %42, %cst_26 {dimension_numbers = #tpu.dot_dimension_numbers<[1], [0], [0], [1], [0, 0, 1, 1], [], []>} : vector<128x128xbf16>, vector<128x128xbf16>, vector<128x128xf32> -> vector<128x128xf32>
      %c0_27 = arith.constant 0 : index
      %c0_28 = arith.constant 0 : index
      %44 = vector.load %arg18[%c0_27, %c0_28] : memref<1x128xf32, #tpu.memory_space<vmem>>, vector<1x128xf32>
      %45 = vector.broadcast %44 : vector<1x128xf32> to vector<128x128xf32>
      %46 = arith.addf %43, %45 : vector<128x128xf32>
      %cst_29 = arith.constant 0.000000e+00 : f32
      %47 = vector.broadcast %cst_29 : f32 to vector<128x128xf32>
      %48 = arith.subf %47, %46 : vector<128x128xf32>
      %49 = math.exp %48 : vector<128x128xf32>
      %cst_30 = arith.constant 1.000000e+00 : f32
      %50 = vector.broadcast %cst_30 : f32 to vector<128x128xf32>
      %51 = arith.addf %50, %49 : vector<128x128xf32>
      %52 = tpu.reciprocal %51 {approx = true} : vector<128x128xf32> -> vector<128x128xf32>
      %53 = arith.mulf %46, %52 : vector<128x128xf32>
      %54 = arith.truncf %53 : vector<128x128xf32> to vector<128x128xbf16>
      %c0_31 = arith.constant 0 : index
      %c0_32 = arith.constant 0 : index
      %55 = vector.load %arg19[%c0_31, %c0_32] : memref<128x128xbf16, #tpu.memory_space<vmem>>, vector<128x128xbf16>
      %cst_33 = arith.constant dense<0.000000e+00> : vector<128x128xf32>
      %56 = tpu.matmul %54, %55, %cst_33 {dimension_numbers = #tpu.dot_dimension_numbers<[1], [0], [0], [1], [0, 0, 1, 1], [], []>} : vector<128x128xbf16>, vector<128x128xbf16>, vector<128x128xf32> -> vector<128x128xf32>
      %c0_34 = arith.constant 0 : index
      %c0_35 = arith.constant 0 : index
      %57 = vector.load %arg20[%c0_34, %c0_35] : memref<1x128xf32, #tpu.memory_space<vmem>>, vector<1x128xf32>
      %58 = vector.broadcast %57 : vector<1x128xf32> to vector<128x128xf32>
      %59 = arith.addf %56, %58 : vector<128x128xf32>
      %60 = vector.extract_strided_slice %40 {offsets = [0, 0], sizes = [128, 1], strides = [1, 1]} : vector<128x3xf32> to vector<128x1xf32>
      %61 = vector.broadcast %60 : vector<128x1xf32> to vector<128x128xf32>
      %62 = arith.mulf %59, %61 : vector<128x128xf32>
      %63 = vector.extract_strided_slice %40 {offsets = [0, 1], sizes = [128, 1], strides = [1, 1]} : vector<128x3xf32> to vector<128x1xf32>
      %64 = vector.broadcast %63 : vector<128x1xf32> to vector<128x128xf32>
      %65 = arith.mulf %59, %64 : vector<128x128xf32>
      %66 = vector.extract_strided_slice %40 {offsets = [0, 2], sizes = [128, 1], strides = [1, 1]} : vector<128x3xf32> to vector<128x1xf32>
      %67 = vector.broadcast %66 : vector<128x1xf32> to vector<128x128xf32>
      %68 = arith.mulf %59, %67 : vector<128x128xf32>
      %69 = tpu.concatenate %62, %65, %68 in 1 : vector<128x128xf32>, vector<128x128xf32>, vector<128x128xf32> -> vector<128x384xf32>
      %70 = arith.truncf %69 : vector<128x384xf32> to vector<128x384xbf16>
      %c0_36 = arith.constant 0 : index
      %c0_37 = arith.constant 0 : index
      %71 = vector.load %arg21[%c0_36, %c0_37] : memref<16x384xf32, #tpu.memory_space<vmem>>, vector<16x384xf32>
      %c0_38 = arith.constant 0 : index
      %c0_39 = arith.constant 0 : index
      %72 = vector.load %arg3[%c0_38, %c0_39] : memref<16x128xbf16, #tpu.memory_space<vmem>>, vector<16x128xbf16>
      %cst_40 = arith.constant dense<0.000000e+00> : vector<16x384xf32>
      %73 = tpu.matmul %72, %70, %cst_40 {dimension_numbers = #tpu.dot_dimension_numbers<[1], [0], [0], [1], [0, 0, 1, 1], [], []>} : vector<16x128xbf16>, vector<128x384xbf16>, vector<16x384xf32> -> vector<16x384xf32>
      %74 = arith.addf %71, %73 : vector<16x384xf32>
      %c0_41 = arith.constant 0 : index
      %c0_42 = arith.constant 0 : index
      %75 = vector.load %arg21[%c0_41, %c0_42] : memref<16x384xf32, #tpu.memory_space<vmem>>, vector<16x384xf32>
      tpu.vector_store %arg21[%c0_41, %c0_42], %74 {strides = array<i32>} : memref<16x384xf32, #tpu.memory_space<vmem>>, vector<16x384xf32>,
    } else {
    }
    %c1_i32_20 = arith.constant 1 : i32
    %36 = arith.cmpi eq, %arg1, %c1_i32_20 : i32
    %37 = arith.andi %36, %1 : i1
    %38 = arith.extui %37 : i1 to i32
    %c0_i32_21 = arith.constant 0 : i32
    %39 = arith.cmpi ne, %38, %c0_i32_21 : i32
    scf.if %39 {
      %c0_22 = arith.constant 0 : index
      %c0_23 = arith.constant 0 : index
      %40 = vector.load %arg22[%c0_22, %c0_23] : memref<16x128xf32, #tpu.memory_space<vmem>>, vector<16x128xf32>
      %41 = arith.truncf %40 : vector<16x128xf32> to vector<16x128xbf16>
      %c0_24 = arith.constant 0 : index
      %c0_25 = arith.constant 0 : index
      %42 = vector.load %arg24[%c0_24, %c0_25] : memref<16x128xf32, #tpu.memory_space<vmem>>, vector<16x128xf32>
      %43 = arith.truncf %42 : vector<16x128xf32> to vector<16x128xbf16>
      %44 = tpu.concatenate %41, %43 in 1 : vector<16x128xbf16>, vector<16x128xbf16> -> vector<16x256xbf16>
      %c0_26 = arith.constant 0 : index
      %c0_27 = arith.constant 0 : index
      %45 = vector.load %arg13[%c0_26, %c0_27] : memref<256x128xbf16, #tpu.memory_space<vmem>>, vector<256x128xbf16>
      %cst_28 = arith.constant dense<0.000000e+00> : vector<16x128xf32>
      %46 = tpu.matmul %44, %45, %cst_28 {dimension_numbers = #tpu.dot_dimension_numbers<[1], [0], [0], [1], [0, 0, 1, 1], [], []>} : vector<16x256xbf16>, vector<256x128xbf16>, vector<16x128xf32> -> vector<16x128xf32>
      %c0_29 = arith.constant 0 : index
      %c0_30 = arith.constant 0 : index
      %47 = vector.load %arg14[%c0_29, %c0_30] : memref<1x128xf32, #tpu.memory_space<vmem>>, vector<1x128xf32>
      %48 = vector.broadcast %47 : vector<1x128xf32> to vector<16x128xf32>
      %49 = arith.addf %46, %48 : vector<16x128xf32>
      %c0_31 = arith.constant 0 : index
      %c0_32 = arith.constant 0 : index
      %50 = vector.load %arg22[%c0_31, %c0_32] : memref<16x128xf32, #tpu.memory_space<vmem>>, vector<16x128xf32>
      %cst_33 = arith.constant 0.000000e+00 : f32
      %51 = vector.broadcast %cst_33 : f32 to vector<16x128xf32>
      %52 = arith.subf %51, %49 : vector<16x128xf32>
      %53 = math.exp %52 : vector<16x128xf32>
      %cst_34 = arith.constant 1.000000e+00 : f32
      %54 = vector.broadcast %cst_34 : f32 to vector<16x128xf32>
      %55 = arith.addf %54, %53 : vector<16x128xf32>
      %56 = tpu.reciprocal %55 {approx = true} : vector<16x128xf32> -> vector<16x128xf32>
      %57 = arith.mulf %49, %56 : vector<16x128xf32>
      %58 = arith.truncf %57 : vector<16x128xf32> to vector<16x128xbf16>
      %c0_35 = arith.constant 0 : index
      %c0_36 = arith.constant 0 : index
      %59 = vector.load %arg15[%c0_35, %c0_36] : memref<128x128xbf16, #tpu.memory_space<vmem>>, vector<128x128xbf16>
      %cst_37 = arith.constant dense<0.000000e+00> : vector<16x128xf32>
      %60 = tpu.matmul %58, %59, %cst_37 {dimension_numbers = #tpu.dot_dimension_numbers<[1], [0], [0], [1], [0, 0, 1, 1], [], []>} : vector<16x128xbf16>, vector<128x128xbf16>, vector<16x128xf32> -> vector<16x128xf32>
      %61 = arith.addf %50, %60 : vector<16x128xf32>
      %c0_38 = arith.constant 0 : index
      %c0_39 = arith.constant 0 : index
      %62 = vector.load %arg16[%c0_38, %c0_39] : memref<1x128xf32, #tpu.memory_space<vmem>>, vector<1x128xf32>
      %63 = vector.broadcast %62 : vector<1x128xf32> to vector<16x128xf32>
      %64 = arith.addf %61, %63 : vector<16x128xf32>
      %c0_40 = arith.constant 0 : index
      %c0_41 = arith.constant 0 : index
      %65 = vector.load %arg22[%c0_40, %c0_41] : memref<16x128xf32, #tpu.memory_space<vmem>>, vector<16x128xf32>
      tpu.vector_store %arg22[%c0_40, %c0_41], %64 {strides = array<i32>} : memref<16x128xf32, #tpu.memory_space<vmem>>, vector<16x128xf32>,
    } else {
    }
    return
  }
  func.func @transform_0(%arg0: i32, %arg1: i32) -> (i32, i32) {
    %c0_i32 = arith.constant 0 : i32
    %c0_i32_0 = arith.constant 0 : i32
    return %arg1, %c0_i32 : i32, i32
  }
  func.func @transform_1(%arg0: i32, %arg1: i32) -> (i32, i32) {
    %c0_i32 = arith.constant 0 : i32
    %c0_i32_0 = arith.constant 0 : i32
    return %c0_i32, %arg1 : i32, i32
  }
  func.func @transform_2(%arg0: i32, %arg1: i32) -> (i32, i32) {
    %c0_i32 = arith.constant 0 : i32
    %c0_i32_0 = arith.constant 0 : i32
    return %arg1, %c0_i32 : i32, i32
  }
  func.func @transform_3(%arg0: i32, %arg1: i32) -> (i32, i32) {
    %c0_i32 = arith.constant 0 : i32
    %c0_i32_0 = arith.constant 0 : i32
    return %arg1, %c0_i32 : i32, i32
  }
  func.func @transform_4(%arg0: i32, %arg1: i32) -> (i32, i32) {
    %c0_i32 = arith.constant 0 : i32
    %c0_i32_0 = arith.constant 0 : i32
    %c0_i32_1 = arith.constant 0 : i32
    return %c0_i32, %c0_i32_0 : i32, i32
  }
  func.func @transform_5(%arg0: i32, %arg1: i32) -> (i32, i32) {
    %c0_i32 = arith.constant 0 : i32
    %c0_i32_0 = arith.constant 0 : i32
    %c0_i32_1 = arith.constant 0 : i32
    return %c0_i32, %c0_i32_0 : i32, i32
  }
  func.func @transform_6(%arg0: i32, %arg1: i32) -> (i32, i32) {
    %c0_i32 = arith.constant 0 : i32
    %c0_i32_0 = arith.constant 0 : i32
    %c0_i32_1 = arith.constant 0 : i32
    return %c0_i32, %c0_i32_0 : i32, i32
  }
  func.func @transform_7(%arg0: i32, %arg1: i32) -> (i32, i32) {
    %c0_i32 = arith.constant 0 : i32
    %c0_i32_0 = arith.constant 0 : i32
    %c0_i32_1 = arith.constant 0 : i32
    return %c0_i32, %c0_i32_0 : i32, i32
  }
  func.func @transform_8(%arg0: i32, %arg1: i32) -> (i32, i32) {
    %c0_i32 = arith.constant 0 : i32
    %c0_i32_0 = arith.constant 0 : i32
    %c0_i32_1 = arith.constant 0 : i32
    return %c0_i32, %c0_i32_0 : i32, i32
  }
  func.func @transform_9(%arg0: i32, %arg1: i32) -> (i32, i32) {
    %c0_i32 = arith.constant 0 : i32
    %c0_i32_0 = arith.constant 0 : i32
    %c0_i32_1 = arith.constant 0 : i32
    return %c0_i32, %c0_i32_0 : i32, i32
  }
  func.func @transform_10(%arg0: i32, %arg1: i32) -> (i32, i32) {
    %c0_i32 = arith.constant 0 : i32
    %c0_i32_0 = arith.constant 0 : i32
    %c0_i32_1 = arith.constant 0 : i32
    return %c0_i32, %c0_i32_0 : i32, i32
  }
  func.func @transform_11(%arg0: i32, %arg1: i32) -> (i32, i32) {
    %c0_i32 = arith.constant 0 : i32
    %c0_i32_0 = arith.constant 0 : i32
    %c0_i32_1 = arith.constant 0 : i32
    return %c0_i32, %c0_i32_0 : i32, i32
  }
  func.func @transform_12(%arg0: i32, %arg1: i32) -> (i32, i32) {
    %c0_i32 = arith.constant 0 : i32
    %c0_i32_0 = arith.constant 0 : i32
    %c0_i32_1 = arith.constant 0 : i32
    return %c0_i32, %c0_i32_0 : i32, i32
  }
  func.func @transform_13(%arg0: i32, %arg1: i32) -> (i32, i32) {
    %c0_i32 = arith.constant 0 : i32
    %c0_i32_0 = arith.constant 0 : i32
    %c0_i32_1 = arith.constant 0 : i32
    return %c0_i32, %c0_i32_0 : i32, i32
  }
  func.func @transform_14(%arg0: i32, %arg1: i32) -> (i32, i32) {
    %c0_i32 = arith.constant 0 : i32
    %c0_i32_0 = arith.constant 0 : i32
    %c0_i32_1 = arith.constant 0 : i32
    return %c0_i32, %c0_i32_0 : i32, i32
  }
  func.func @transform_15(%arg0: i32, %arg1: i32) -> (i32, i32) {
    %c0_i32 = arith.constant 0 : i32
    %c0_i32_0 = arith.constant 0 : i32
    %c0_i32_1 = arith.constant 0 : i32
    return %c0_i32, %c0_i32_0 : i32, i32
  }
  func.func @transform_16(%arg0: i32, %arg1: i32) -> (i32, i32) {
    %c0_i32 = arith.constant 0 : i32
    %c0_i32_0 = arith.constant 0 : i32
    %c0_i32_1 = arith.constant 0 : i32
    return %c0_i32, %c0_i32_0 : i32, i32
  }
  func.func @transform_17(%arg0: i32, %arg1: i32) -> (i32, i32) {
    %c0_i32 = arith.constant 0 : i32
    %c0_i32_0 = arith.constant 0 : i32
    %c0_i32_1 = arith.constant 0 : i32
    return %c0_i32, %c0_i32_0 : i32, i32
  }
  func.func @transform_18(%arg0: i32, %arg1: i32) -> (i32, i32) {
    %c0_i32 = arith.constant 0 : i32
    %c0_i32_0 = arith.constant 0 : i32
    %c0_i32_1 = arith.constant 0 : i32
    return %c0_i32, %c0_i32_0 : i32, i32
  }
  func.func @transform_19(%arg0: i32, %arg1: i32) -> (i32, i32) {
    %c0_i32 = arith.constant 0 : i32
    %c0_i32_0 = arith.constant 0 : i32
    %c0_i32_1 = arith.constant 0 : i32
    return %c0_i32, %c0_i32_0 : i32, i32
  }
}

</mosaic_0001>

<bundles_post_ra>
// kernel: tpu_custom_call.1
= control target key start
LH: loop header
LB: loop body
LE: loop exit
PB: predicated region body
PF: predicated region fallthrough
CT: control target
= control target key end

     0   :  { %s5151_s0 = inlined_call_operand.vmem [shape: bf16[256,32], index: 0, kind: input, shape index: {}]   ;;  %s5152_s1 = inlined_call_operand.hbm [shape: bf16[16,256], index: 1, kind: input, shape index: {}]   ;;  %s5153_s2 = inlined_call_operand.vmem [shape: f32[256,128], index: 2, kind: input, shape index: {}]   ;;  %s5154_s3 = inlined_call_operand.vmem [shape: f32[256,3], index: 3, kind: input, shape index: {}]   ;;  %s5155_s4 = inlined_call_operand.vmem [shape: bf16[16,4], index: 4, kind: input, shape index: {}]   ;;  %s5156_s5 = inlined_call_operand.hbm [shape: bf16[4,128], index: 5, kind: input, shape index: {}]   ;;  %s5157_s6 = inlined_call_operand.vmem [shape: f32[1,128], index: 6, kind: input, shape index: {}]   ;;  %s5158_s7 = inlined_call_operand.vmem [shape: bf16[128,128], index: 7, kind: input, shape index: {}]   ;;  %s5159_s8 = inlined_call_operand.hbm [shape: bf16[128,128], index: 8, kind: input, shape index: {}]   ;;  %s5160_s9 = inlined_call_operand.hbm [shape: bf16[128,128], index: 9, kind: input, shape index: {}]   ;;  %s5161_s10 = inlined_call_operand.vmem [shape: f32[1,128], index: 10, kind: input, shape index: {}]   ;;  %s5162_s11 = inlined_call_operand.vmem [shape: bf16[256,128], index: 11, kind: input, shape index: {}]   ;;  %s5163_s12 = inlined_call_operand.vmem [shape: f32[1,128], index: 12, kind: input, shape index: {}]   ;;  %s5164_s13 = inlined_call_operand.hbm [shape: bf16[128,128], index: 13, kind: input, shape index: {}]   ;;  %s5165_s14 = inlined_call_operand.vmem [shape: f32[1,128], index: 14, kind: input, shape index: {}]   ;;  %s5166_s15 = inlined_call_operand.hbm [shape: bf16[128,128], index: 15, kind: input, shape index: {}]   ;;  %s5167_s16 = inlined_call_operand.vmem [shape: f32[1,128], index: 16, kind: input, shape index: {}]   ;;  %s5168_s17 = inlined_call_operand.hbm [shape: bf16[128,128], index: 17, kind: input, shape index: {}]   ;;  %s5169_s18 = inlined_call_operand.vmem [shape: f32[1,128], index: 18, kind: input, shape index: {}]   ;;  %s5170_s19 = inlined_call_operand.hbm [shape: f32[16,384], index: 19, kind: output, shape index: {}]  }
   0x1   :  { %5197 = sst [smem:[#allocation39_spill]] %s5151_s0 }
   0x2   :  { %5198 = sst [smem:[#allocation40_spill]] %s5152_s1 }
   0x3   :  { %5199 = sst [smem:[#allocation41_spill]] %s5153_s2 }
   0x4   :  { %5200 = sst [smem:[#allocation42_spill]] %s5154_s3 }
   0x5   :  { %5201 = sst [smem:[#allocation43_spill]] %s5155_s4 }
   0x6   :  { %5202 = sst [smem:[#allocation44_spill]] %s5156_s5 }
   0x7   :  { %5203 = sst [smem:[#allocation45_spill]] %s5157_s6 }
   0x8   :  { %5204 = sst [smem:[#allocation46_spill]] %s5158_s7 }
   0x9   :  { %5205 = sst [smem:[#allocation47_spill]] %s5160_s9 }
   0xa   :  { %5206 = sst [smem:[#allocation48_spill]] %s5161_s10 }
   0xb   :  { %5207 = sst [smem:[#allocation49_spill]] %s5162_s11 }
   0xc   :  { %5208 = sst [smem:[#allocation50_spill]] %s5163_s12 }
   0xd   :  { %5209 = sst [smem:[#allocation51_spill]] %s5165_s14 }
   0xe   :  { %5210 = sst [smem:[#allocation52_spill]] %s5167_s16 }
   0xf   :  { %5211 = sst [smem:[#allocation53_spill]] %s5169_s18 }
  0x10   :  { %5212 = sst [smem:[#allocation54_spill]] %s5170_s19 }
  0x11   :  { %24 = vsyncpa [#allocation6], 0 }
  0x12   :  { %26 = vsyncpa [#allocation6 + $0x1], 0 }
  0x13   :  { %27 = vsyncpa [#allocation9], 0 }
  0x14   :  { %28 = vsyncpa [#allocation12], 0 }
  0x15   :  { %29 = vsyncpa [#allocation15], 0 }
  0x16   :  { %30 = vsyncpa [#allocation7], 0  ;;  %s4266_s0 = smov 0   ;;  %s4268_s30 = smov 0  }
  0x17   :  { %s4270_s20 = smov 0   ;;  %s4272_s21 = smov 0  }
  0x18   :  { %s4274_s1 = smov 0   ;;  %s4276_s22 = smov 0  }
  0x19   :  { %s4278_s2 = smov 0   ;;  %s4280_s23 = smov 0  }
  0x1a LB: > { %s5172_s24 = sadd.s32 4294967295, %s4137_s23   ;;  %p2952_p0 = scmp.ge.s32.totalorder %s4137_s23, 1  ;;  %s4137_s23 = sphi %s4280_s23, %s36_s23   ;;  %s4133_s2 = sphi %s4278_s2, %s5282_s2   ;;  %s4129_s22 = sphi %s4276_s22, %s5281_s22   ;;  %s4125_s1 = sphi %s4274_s1, %s5280_s1   ;;  %s4121_s21 = sphi %s4272_s21, %s5279_s21   ;;  %s4117_s20 = sphi %s4270_s20, %s5278_s20   ;;  %s4113_s30 = sphi %s4268_s30, %s5277_s30   ;;  %s4109_s0 = sphi %s4266_s0, %s5276_s0  }
  0x1b   : > { %p4310_p1 = scmp.eq.s32.totalorder %s5172_s24, 0  ;;  %p493_p2 = scmp.lt.s32.totalorder %s4137_s23, 5 }
  0x1c   : > { %s4139_s26 = smov [#allocation8]   ;;  %s4140_s29 = smov [#allocation11]  }
  0x1d   : > { %s5213_s25 = scalar_select %p4310_p1, 1, 0 }
  0x1e   : > { %p4315_p3 = pnand %p2952_p0, %p493_p2  ;;  %s509_s27 = sshll.u32 %s4139_s26, 4  ;;  %s510_s27 = int_to_ptr.vmem [resolvable:$true] %s509_s27 }
  0x1f   : > { %s538_s24 = sshll.u32 %s4140_s29, 4  ;;  %s4141_s19 = smov [#allocation14]   ;;  %s4327_s24 = int_to_ptr.vmem [resolvable:$true] %s538_s24 }
  0x20   : > { %s5214_s3 = scalar_select %p4315_p3, 1, 0 }
  0x21   : > { %p3467_p4 = pneg %p4315_p3  ;;  %s4329_s14 = sshll.u32 %s4141_s19, 4  ;;  %s577_s14 = int_to_ptr.vmem [resolvable:$true] %s4329_s14 }
  0x22   : > { %s5216_s5 = sld [smem:[#allocation44_spill]] }
  0x23   : > { %p4323_p5 = pnand %p3467_p4, %p4310_p1 }
  0x25   : > { %p4339_p7 = pneg %p4323_p5 }
  0x28   : > { %s3831_s26 = scalar_lea.hbm %s5216_s5, 32 }
  0x29   : > { %p3832_p6 = scmp.ne.s32.totalorder %s5216_s5, %s3831_s26  ;;  %p3838_p10 = scmp.lt.u32.totalorder %s3831_s26, %s5216_s5 }
  0x2b   : > { %p3834_p8 = pnand %p4339_p7, %p3832_p6 }
  0x2d   : > { %p3835_p9 = pneg %p3834_p8 }
  0x2f   : > { %p3840_p11 = pnand %p3838_p10, %p3835_p9 }
  0x31   : > { %3843 = shalt.err (!%p3840_p11)
}
  0x32   : > { %s3844_s11 = scalar_lea.vmem %s510_s27, 32  ;;  %p3852_p2 = scmp.lt.s32.totalorder %s510_s27, %s510_s27 }
  0x33   : > { %p3845_p12 = scmp.ne.s32.totalorder %s510_s27, %s3844_s11  ;;  %p3853_p4 = scmp.lt.s32.totalorder %s3844_s11, %s3844_s11 }
  0x35   : > { %p3847_p13 = pnand %p3845_p12, %p4339_p7  ;;  %p3854_p3 = por %p3853_p4, %p3852_p2 }
  0x37   : > { %p3848_p0 = pneg %p3847_p13 }
  0x39   : > { %p3855_p1 = pnand %p3854_p3, %p3848_p0 }
  0x3b   : > { %3858 = shalt.err (!%p3855_p1)
}
  0x3c   : > { %3470 = dma.hbm_to_vmem [thread:$0]  (!%p4323_p5), %s5216_s5, 32, %s510_s27, [#allocation9]  }
  0x3d   : > { %s5218_s9 = sld [smem:[#allocation47_spill]] }
  0x43   : > { %s3859_s29 = scalar_lea.hbm %s5218_s9, 1024 }
  0x44   : > { %p3860_p6 = scmp.ne.s32.totalorder %s5218_s9, %s3859_s29  ;;  %p3866_p1 = scmp.lt.u32.totalorder %s3859_s29, %s5218_s9 }
  0x46   : > { %p3862_p8 = pnand %p3860_p6, %p4339_p7 }
  0x48   : > { %p3863_p9 = pneg %p3862_p8 }
  0x4a   : > { %p3868_p3 = pnand %p3866_p1, %p3863_p9 }
  0x4c   : > { %3871 = shalt.err (!%p3868_p3)
}
  0x4d   : > { %s3872_s27 = scalar_lea.vmem %s4327_s24, 1024  ;;  %p3880_p13 = scmp.lt.s32.totalorder %s4327_s24, %s4327_s24 }
  0x4e   : > { %p3873_p10 = scmp.ne.s32.totalorder %s4327_s24, %s3872_s27  ;;  %p3881_p0 = scmp.lt.s32.totalorder %s3872_s27, %s3872_s27 }
  0x50   : > { %p3875_p11 = pnand %p3873_p10, %p4339_p7  ;;  %p3882_p2 = por %p3881_p0, %p3880_p13 }
  0x52   : > { %p3876_p12 = pneg %p3875_p11 }
  0x54   : > { %p3883_p4 = pnand %p3882_p2, %p3876_p12 }
  0x56   : > { %3886 = shalt.err (!%p3883_p4)
}
  0x57   : > { %s4142_s7 = smov 64   ;;  %s4143_s6 = smov 4  }
  0x58   : > { %3476 = dma.hbm_to_vmem [thread:$0]  (!%p4323_p5), %s5218_s9, 1024, %s4327_s24, [#allocation12], %s4142_s7, %s4142_s7, %s4143_s6  }
  0x59   : > { %s3887_s29 = scalar_lea.hbm %s5166_s15, 1024 }
  0x5a   : > { %p3888_p6 = scmp.ne.s32.totalorder %s5166_s15, %s3887_s29  ;;  %p3894_p1 = scmp.lt.u32.totalorder %s3887_s29, %s5166_s15 }
  0x5c   : > { %p3890_p8 = pnand %p3888_p6, %p4339_p7 }
  0x5e   : > { %p3891_p9 = pneg %p3890_p8 }
  0x60   : > { %p3896_p3 = pnand %p3894_p1, %p3891_p9 }
  0x62   : > { %3899 = shalt.err (!%p3896_p3)
}
  0x63   : > { %s3900_s12 = scalar_lea.vmem %s577_s14, 1024  ;;  %p3908_p13 = scmp.lt.s32.totalorder %s577_s14, %s577_s14 }
  0x64   : > { %p3901_p10 = scmp.ne.s32.totalorder %s577_s14, %s3900_s12  ;;  %p3909_p0 = scmp.lt.s32.totalorder %s3900_s12, %s3900_s12 }
  0x66   : > { %p3903_p11 = pnand %p3901_p10, %p4339_p7  ;;  %p3910_p2 = por %p3909_p0, %p3908_p13 }
  0x68   : > { %p3904_p12 = pneg %p3903_p11 }
  0x6a   : > { %p3911_p4 = pnand %p3910_p2, %p3904_p12 }
  0x6c   : > { %3914 = shalt.err (!%p3911_p4)
}
  0x6d   : > { %3482 = dma.hbm_to_vmem [thread:$0]  (!%p4323_p5), %s5166_s15, 1024, %s577_s14, [#allocation15], %s4142_s7, %s4142_s7, %s4143_s6  }
  0x6e   : > { %s4144_s16 = smov [#allocation10]   ;;  %s4145_s26 = smov [#allocation13]  }
  0x6f   : > { %s525_s18 = sshll.u32 %s4144_s16, 4  ;;  %s560_s29 = sshll.u32 %s4145_s26, 4  ;;  %s526_s18 = int_to_ptr.vmem [resolvable:$true] %s525_s18  ;;  %s561_s29 = int_to_ptr.vmem [resolvable:$true] %s560_s29 }
  0x70   : > { %s3915_s27 = scalar_lea.hbm %s5159_s8, 1024 }
  0x71   : > { %p3916_p6 = scmp.ne.s32.totalorder %s5159_s8, %s3915_s27  ;;  %p3922_p1 = scmp.lt.u32.totalorder %s3915_s27, %s5159_s8 }
  0x73   : > { %p3918_p8 = pnand %p3916_p6, %p4339_p7 }
  0x75   : > { %p3919_p9 = pneg %p3918_p8 }
  0x77   : > { %p3924_p3 = pnand %p3922_p1, %p3919_p9 }
  0x79   : > { %3927 = shalt.err (!%p3924_p3)
}
  0x7a   : > { %s3928_s14 = scalar_lea.vmem %s526_s18, 1024  ;;  %p3936_p13 = scmp.lt.s32.totalorder %s526_s18, %s526_s18 }
  0x7b   : > { %p3929_p10 = scmp.ne.s32.totalorder %s526_s18, %s3928_s14  ;;  %p3937_p0 = scmp.lt.s32.totalorder %s3928_s14, %s3928_s14 }
  0x7d   : > { %p3931_p11 = pnand %p3929_p10, %p4339_p7  ;;  %p3938_p2 = por %p3937_p0, %p3936_p13 }
  0x7f   : > { %p3932_p12 = pneg %p3931_p11 }
  0x81   : > { %p3939_p4 = pnand %p3938_p2, %p3932_p12 }
  0x83   : > { %3942 = shalt.err (!%p3939_p4)
}
  0x84   : > { %3473 = dma.hbm_to_vmem [thread:$0]  (!%p4323_p5), %s5159_s8, 1024, %s526_s18, [#allocation9], %s4142_s7, %s4142_s7, %s4143_s6  }
  0x85   : > { %s3943_s26 = scalar_lea.hbm %s5164_s13, 1024 }
  0x86   : > { %p3944_p6 = scmp.ne.s32.totalorder %s5164_s13, %s3943_s26  ;;  %p3950_p1 = scmp.lt.u32.totalorder %s3943_s26, %s5164_s13 }
  0x88   : > { %p3946_p8 = pnand %p3944_p6, %p4339_p7 }
  0x8a   : > { %p3947_p9 = pneg %p3946_p8 }
  0x8c   : > { %p3952_p3 = pnand %p3950_p1, %p3947_p9 }
  0x8e   : > { %3955 = shalt.err (!%p3952_p3)
}
  0x8f   : > { %s3956_s5 = scalar_lea.vmem %s561_s29, 1024  ;;  %p3964_p13 = scmp.lt.s32.totalorder %s561_s29, %s561_s29 }
  0x90   : > { %p3957_p10 = scmp.ne.s32.totalorder %s561_s29, %s3956_s5  ;;  %p3965_p0 = scmp.lt.s32.totalorder %s3956_s5, %s3956_s5 }
  0x92   : > { %p3959_p11 = pnand %p3957_p10, %p4339_p7  ;;  %p3966_p2 = por %p3965_p0, %p3964_p13 }
  0x94   : > { %p3960_p12 = pneg %p3959_p11 }
  0x96   : > { %p3967_p4 = pnand %p3966_p2, %p3960_p12 }
  0x98   : > { %3970 = shalt.err (!%p3967_p4)
}
  0x99   : > { %3479 = dma.hbm_to_vmem [thread:$0]  (!%p4323_p5), %s5164_s13, 1024, %s561_s29, [#allocation12], %s4142_s7, %s4142_s7, %s4143_s6  }
  0x9a   : > { %s4146_s4 = smov [#allocation16]   ;;  %s3971_s26 = scalar_lea.hbm %s5168_s17, 1024 }
  0x9b   : > { %s592_s9 = sshll.u32 %s4146_s4, 4  ;;  %p3972_p6 = scmp.ne.s32.totalorder %s5168_s17, %s3971_s26  ;;  %s593_s9 = int_to_ptr.vmem [resolvable:$true] %s592_s9 }
  0x9c   : > { %p3978_p1 = scmp.lt.u32.totalorder %s3971_s26, %s5168_s17 }
  0x9d   : > { %p3974_p8 = pnand %p3972_p6, %p4339_p7 }
  0x9f   : > { %p3975_p9 = pneg %p3974_p8 }
  0xa1   : > { %p3980_p3 = pnand %p3978_p1, %p3975_p9 }
  0xa3   : > { %3983 = shalt.err (!%p3980_p3)
}
  0xa4   : > { %s3984_s29 = scalar_lea.vmem %s593_s9, 1024  ;;  %p3992_p13 = scmp.lt.s32.totalorder %s593_s9, %s593_s9 }
  0xa5   : > { %p3985_p10 = scmp.ne.s32.totalorder %s593_s9, %s3984_s29  ;;  %p3993_p0 = scmp.lt.s32.totalorder %s3984_s29, %s3984_s29 }
  0xa7   : > { %p3987_p11 = pnand %p3985_p10, %p4339_p7  ;;  %p3994_p2 = por %p3993_p0, %p3992_p13 }
  0xa9   : > { %p3988_p12 = pneg %p3987_p11 }
  0xab   : > { %p3995_p4 = pnand %p3994_p2, %p3988_p12 }
  0xad   : > { %3998 = shalt.err (!%p3995_p4)
}
  0xae   : > { %3485 = dma.hbm_to_vmem [thread:$0]  (!%p4323_p5), %s5168_s17, 1024, %s593_s9, [#allocation15], %s4142_s7, %s4142_s7, %s4143_s6  }
  0xaf   : > { %s45_s10 = sadd.s32 1, %s4129_s22  ;;  %s48_s28 = sadd.s32 1, %s4133_s2 }
  0xb0   : > { %p46_p7 = scmp.ge.s32.totalorder %s45_s10, 2  ;;  %s81_s14 = sadd.s32 1, %s4117_s20 }
  0xb1   : > { %p88_p6 = scmp.ne.s32.totalorder %s4117_s20, %s4113_s30  ;;  %p89_p8 = scmp.eq.s32.totalorder %s4137_s23, 0 }
  0xb2   : > { %s5284_s10 = smov (%p46_p7, %s45_s10), 0  ;;  %s5286_s28 = smov (!%p46_p7, %s48_s28), %s4133_s2 }
  0xb3   : > { %s78_s4 = ssub.s32 %s4129_s22, %s5284_s10  ;;  %p4477_p9 = por %p89_p8, %p88_p6 }
  0xb4   : > { %p50_p5 = scmp.ge.s32.totalorder %s5286_s28, 2  ;;  %p79_p1 = scmp.eq.s32.totalorder %s78_s4, 0 }
  0xb5   : > { %p94_p3 = scmp.ne.s32.totalorder %s4113_s30, %s4109_s0  ;;  %p3496_p10 = scmp.lt.s32.totalorder %s4137_s23, 4 }
  0xb6   : > { %s5288_s28 = smov (%p50_p5, %s5286_s28), 0  ;;  %p5220_p11 = scmp.ne.s32.totalorder %s5213_s25, 0 }
  0xb7   : > { %s4487_s9 = scalar_select %p79_p1, %s4117_s20, %s81_s14  }
  0xb8   : > { %p4491_p12 = por %p5220_p11, %p94_p3  ;;  %s618_s26 = sand.u32 1, %s4117_s20  }
  0xb9   : > { %s2960_s19 = sshll.u32 %s618_s26, 3  ;;  %s2961_s11 = sshll.u32 %s4129_s22, 6 }
  0xba   : > { %s5222_s29 = sld [smem:[#allocation40_spill]]  ;;  %s622_s0 = scalar_lea.vmem [#allocation5], %s2960_s19 }
  0xbb   : > { %s628_s18 = sshll.u32 %s622_s0, 4  ;;  %p4506_p13 = pnand %p3496_p10, %p4477_p9  ;;  %s4502_s18 = int_to_ptr.vmem [resolvable:$true] %s628_s18 }
  0xbc   : > { %s4510_s4 = scalar_lea.sflag [#allocation6], %s618_s26 }
  0xbd   : > { %p4001_p2 = pneg %p4506_p13 }
  0xc0   : > { %s4500_s5 = scalar_lea.hbm %s5222_s29, %s2961_s11  ;;  %s4004_s24 = scalar_lea.hbm %s5222_s29, 256 }
  0xc1   : > { %s3999_s27 = scalar_lea.hbm %s4500_s5, 128  ;;  %p4005_p6 = scmp.lt.u32.totalorder %s4500_s5, %s5222_s29 }
  0xc2   : > { %p4000_p0 = scmp.ne.s32.totalorder %s4500_s5, %s3999_s27  ;;  %p4006_p8 = scmp.lt.u32.totalorder %s4004_s24, %s3999_s27 }
  0xc3   : > { %p4008_p5 = scmp.lt.u32.totalorder %s3999_s27, %s4500_s5 }
  0xc4   : > { %p4002_p4 = pnand %p4001_p2, %p4000_p0  ;;  %p4007_p9 = por %p4006_p8, %p4005_p6 }
  0xc6   : > { %p4003_p7 = pneg %p4002_p4  ;;  %p4009_p1 = por %p4008_p5, %p4007_p9 }
  0xc8   : > { %p4010_p3 = pnand %p4009_p1, %p4003_p7 }
  0xca   : > { %4013 = shalt.err (!%p4010_p3)
}
  0xcb   : > { %s4014_s26 = scalar_lea.vmem %s4502_s18, 128  ;;  %s4147_s19 = smov [#allocation5]  }
  0xcc   : > { %p4015_p10 = scmp.ne.s32.totalorder %s4502_s18, %s4014_s26  ;;  %s4019_s11 = sshll.u32 %s4147_s19, 4  ;;  %s4020_s11 = int_to_ptr.vmem [resolvable:$false] %s4019_s11 }
  0xcd   : > { %s4021_s12 = scalar_lea.vmem %s4020_s11, 256  ;;  %p4022_p4 = scmp.lt.s32.totalorder %s4502_s18, %s4020_s11 }
  0xce   : > { %p4017_p11 = pnand %p4015_p10, %p4001_p2  ;;  %p4023_p6 = scmp.lt.s32.totalorder %s4021_s12, %s4014_s26 }
  0xd0   : > { %p4018_p0 = pneg %p4017_p11  ;;  %p4024_p8 = por %p4023_p6, %p4022_p4 }
  0xd2   : > { %p4025_p9 = pnand %p4024_p8, %p4018_p0 }
  0xd4   : > { %4028 = shalt.err (!%p4025_p9)
}
  0xd5   : > { %s4148_s27 = smov 128   ;;  %p5224_p2 = scmp.ne.s32.totalorder %s5214_s3, 0 }
  0xd6   : > { %3489 = dma.hbm_to_vmem [thread:$0]  (!%p4506_p13), %s4500_s5, 128, %s4502_s18, %s4510_s4, %s4148_s27, %s4142_s7, %s4143_s6  }
  0xd7   : > { %658 = sbr.rel (%p5224_p2) target bundleno = 2724 (0xaa4), region = 96 }
  0xde   : > { %s660_s24 = sand.u32 1, %s4113_s30  }
  0xdf   : > { %s4543_s0 = sshll.u32 %s660_s24, 3  ;;  %s661_s26 = scalar_lea.sflag [#allocation6], %s660_s24 }
  0xe0   : > { %4088 = dma.done.wait (%p4491_p12), %s661_s26, 128  }
  0xe1   : > { %4090 = vsyncadd (%p4491_p12), %s661_s26, 4294967168  ;;  %p5225_p7 = scmp.ne.s32.totalorder %s5213_s25, 0 }
  0xe3   : > { %4092 = dma.done.wait (%p5225_p7), [#allocation9], 1056  }
  0xe4   : > { %4094 = vsyncadd (%p5225_p7), [#allocation9], 4294966240 }
  0xe5   : > { %4096 = dma.done.wait (%p5225_p7), [#allocation12], 2048  }
  0xe6   : > { %4098 = vsyncadd (%p5225_p7), [#allocation12], 4294965248 }
  0xe7   : > { %4100 = dma.done.wait (%p5225_p7), [#allocation15], 2048  }
  0xe8   : > { %4102 = vsyncadd (%p5225_p7), [#allocation15], 4294965248  ;;  %s2970_s3 = sshll.u32 %s4121_s21, 4  ;;  %p772_p12 = scmp.eq.s32.totalorder %s4125_s1, 1 }
  0xe9   : > { %p754_p13 = scmp.lt.s32.totalorder %s2970_s3, 31  ;;  %p773_p5 = scmp.ne.s32.totalorder %s4125_s1, 1 }
  0xea   : > { %p774_p1 = scmp.eq.s32.totalorder %s4125_s1, 0  ;;  %p775_p3 = scmp.eq.s32.totalorder %s4121_s21, 0 }
  0xeb   : > { %s5290_s3 = smov (!%p754_p13, %s2970_s3), 31  ;;  %s5226_s5 = sld [smem:[#allocation39_spill]] }
  0xec   : > { %p776_p10 = pnand %p775_p3, %p774_p1  ;;  %s2971_s7 = sshll.u32 %s5290_s3, 2 }
  0xed   : > { %s2973_s6 = sshll.u32 %s5290_s3, 3  ;;  %s5227_s11 = sld [smem:[#allocation41_spill]]  ;;  %v782_v0 = vld [vmem:[#allocation8] sm:$0x3] (!%p776_p10)  ;;  %vm799_vm0 = vcmask (!%p776_p10), 1041408   ;;  %v4149_v1 = vmov (!%p776_p10), 0.0  }
  0xee   : > { %s5228_s26 = sld [smem:[#allocation42_spill]]  ;;  %779 = sbr.rel (%p776_p10) target bundleno = 463 (0x1cf), region = 128  ;;  %3199 = vmatprep.subr.bf16.mxu0 (!%p776_p10), %v4149_v1  ;;  %v801_v2 = vsel (!%p776_p10), %vm799_vm0, %v782_v0, 0  ;;  %vm4150_vm1 = vmmov (!%p776_p10), 0   ;;  %vm795_vm2 = vcmask (!%p776_p10), 31744  }
  0xef   : > { %3201 = vmatprep.mubr.msk.bf16.mxu0 (!%p776_p10), %vm4150_vm1, %v4149_v1  ;;  %s5229_s16 = sld [smem:[#allocation43_spill]] (!%p776_p10)  ;;  %3200 = vmatpush3.bf16.msra.mxu0 (!%p776_p10), %v801_v2  ;;  %s5230_s14 = sld [smem:[#allocation45_spill]] (!%p776_p10) }
  0xf1   : > { %s4572_s18 = scalar_lea.vmem %s5226_s5, %s2971_s7 }
  0xf3   : > { %s4577_s12 = scalar_lea.vmem %s5227_s11, %s2973_s6 }
  0xf4   : > { %s4582_s19 = scalar_lea.vmem %s5228_s26, %s2973_s6 }
  0xf5   : > { %v3595_v3 = vld [vmem:[%s5229_s16] sm:$0xff]  }
  0xf6   : > { %3202 = vmatmul.mubr.msk.bf16.vlgmr.msra.gmra.mrb[0].mxu0 %vm795_vm2, %v3595_v3  ;;  %v2976_v4 = vld [vmem:[%s5230_s14] ss:$0 sm:$0xff] }
 0x1c9   : > { %v837_v5 = vpop.f32.mrb[0].mxu0 }
 0x1ca   : > { %v838_v6 = vadd.f32 %v2976_v4, %v837_v5  ;;  %v3203_v7 = vpop.f32.mrb[1].mxu0 }
 0x1cb   : > { %v840_v8 = vpop.f32.mrb[2].mxu0 }
 0x1cc   : > { %844 = vst [vmem:[#allocation2] sm:$0xff] %v838_v6  ;;  %v841_v9 = vadd.f32 %v2976_v4, %v840_v8  ;;  %v3204_v10 = vpop.f32.mrb[3].mxu0 }
 0x1ce   : > { %845 = vst [vmem:[#allocation2 + $0x8] sm:$0xff] %v841_v9 }
 0x1cf PF: > { %p2979_p11 = scmp.ne.s32.totalorder %s4121_s21, 0 }
 0x1d0   : > { %s5231_s11 = sld [smem:[#allocation46_spill]] (!%p2979_p11)  ;;  %v4151_v12 = vmov (!%p2979_p11), 0.0   ;;  %v3597_v13 = vld [vmem:[#allocation10] sm:$0xff] (!%p2979_p11)   ;;  %vm4152_vm3 = vmmov (!%p2979_p11), 0   ;;  %v3599_v15 = vld [vmem:[#allocation10 + $0x8] sm:$0xff] (!%p2979_p11)   ;;  %v3601_v17 = vld [vmem:[#allocation10 + $0x10] sm:$0xff] (!%p2979_p11)  }
 0x1d1   : > { %848 = sbr.rel (%p2979_p11) target bundleno = 719 (0x2cf), region = 132  ;;  %849 = vst [vmem:[#allocation4] sm:$0xff] (!%p2979_p11), %v4151_v12  ;;  %850 = vst [vmem:[#allocation4 + $0x8] sm:$0xff] (!%p2979_p11), %v4151_v12  ;;  %3205 = vmatprep.subr.bf16.mxu0 (!%p2979_p11), %v4151_v12  ;;  %3225 = vmatprep.subr.bf16.mxu1 (!%p2979_p11), %v4151_v12  ;;  %v3603_v19 = vld [vmem:[#allocation10 + $0x18] sm:$0xff] (!%p2979_p11)   ;;  %v3605_v21 = vld [vmem:[#allocation10 + $0x20] sm:$0xff] (!%p2979_p11)  }
 0x1d2   : > { %3221 = vmatprep.mubr.msk.bf16.mxu0 (!%p2979_p11), %vm4152_vm3, %v4151_v12  ;;  %3226 = vmatpush3.bf16.msra.mxu1 (!%p2979_p11), %v3597_v13  ;;  %v3607_v23 = vld [vmem:[#allocation10 + $0x28] sm:$0xff] (!%p2979_p11)   ;;  %v3609_v25 = vld [vmem:[#allocation10 + $0x30] sm:$0xff] (!%p2979_p11)   ;;  %v3611_v29 = vld [vmem:[#allocation10 + $0x38] sm:$0xff] (!%p2979_p11)  }
 0x1d3   : > { %3227 = vmatprep.subr.bf16.mxu1 (!%p2979_p11), %v4151_v12  ;;  %3241 = vmatprep.mubr.msk.bf16.mxu1 (!%p2979_p11), %vm4152_vm3, %v4151_v12  ;;  %v851_v27 = vld [vmem:[#allocation2] sm:$0xff] (!%p2979_p11) }
 0x1d5   : > { %v852_v28 = vld [vmem:[#allocation2 + $0x8] sm:$0xff] (!%p2979_p11) }
 0x1d6   : > { %v3596_v11 = vld [vmem:[%s5231_s11] sm:$0xff] (!%p2979_p11)   ;;  %v3598_v14 = vld [vmem:[%s5231_s11 + $0x8] sm:$0xff] (!%p2979_p11)   ;;  %v3600_v16 = vld [vmem:[%s5231_s11 + $0x10] sm:$0xff] (!%p2979_p11)   ;;  %3228 = vmatpush3.bf16.msra.mxu1 (!%p2979_p11), %v3599_v15  ;;  %v853_v30 = vpack.c.bf16 (!%p2979_p11), %v852_v28, %v851_v27 }
 0x1d7   : > { %3206 = vmatpush3.bf16.msra.mxu0 (!%p2979_p11), %v3596_v11  ;;  %3229 = vmatprep.subr.bf16.mxu1 (!%p2979_p11), %v4151_v12  ;;  %v3602_v18 = vld [vmem:[%s5231_s11 + $0x18] sm:$0xff] (!%p2979_p11)   ;;  %v3604_v20 = vld [vmem:[%s5231_s11 + $0x20] sm:$0xff] (!%p2979_p11)   ;;  %v3606_v22 = vld [vmem:[%s5231_s11 + $0x28] sm:$0xff] (!%p2979_p11)  }
 0x1d8   : > { %3207 = vmatprep.subr.bf16.mxu0 %v4151_v12  ;;  %v3608_v24 = vld [vmem:[%s5231_s11 + $0x30] sm:$0xff]   ;;  %v3610_v26 = vld [vmem:[%s5231_s11 + $0x38] sm:$0xff]  }
 0x1da   : > { %3230 = vmatpush3.bf16.msra.mxu1 %v3601_v17 }
 0x1db   : > { %3208 = vmatpush3.bf16.msra.mxu0 %v3598_v14  ;;  %3231 = vmatprep.subr.bf16.mxu1 %v4151_v12 }
 0x1dc   : > { %3209 = vmatprep.subr.bf16.mxu0 %v4151_v12 }
 0x1de   : > { %3232 = vmatpush3.bf16.msra.mxu1 %v3603_v19 }
 0x1df   : > { %3210 = vmatpush3.bf16.msra.mxu0 %v3600_v16  ;;  %3233 = vmatprep.subr.bf16.mxu1 %v4151_v12 }
 0x1e0   : > { %3211 = vmatprep.subr.bf16.mxu0 %v4151_v12 }
 0x1e2   : > { %3234 = vmatpush3.bf16.msra.mxu1 %v3605_v21 }
 0x1e3   : > { %3212 = vmatpush3.bf16.msra.mxu0 %v3602_v18  ;;  %3235 = vmatprep.subr.bf16.mxu1 %v4151_v12 }
 0x1e4   : > { %3213 = vmatprep.subr.bf16.mxu0 %v4151_v12 }
 0x1e6   : > { %3236 = vmatpush3.bf16.msra.mxu1 %v3607_v23 }
 0x1e7   : > { %3214 = vmatpush3.bf16.msra.mxu0 %v3604_v20  ;;  %3237 = vmatprep.subr.bf16.mxu1 %v4151_v12 }
 0x1e8   : > { %3215 = vmatprep.subr.bf16.mxu0 %v4151_v12 }
 0x1ea   : > { %3238 = vmatpush3.bf16.msra.mxu1 %v3609_v25 }
 0x1eb   : > { %3216 = vmatpush3.bf16.msra.mxu0 %v3606_v22  ;;  %3239 = vmatprep.subr.bf16.mxu1 %v4151_v12 }
 0x1ec   : > { %3217 = vmatprep.subr.bf16.mxu0 %v4151_v12 }
 0x1ee   : > { %3240 = vmatpush3.bf16.msra.mxu1 %v3611_v29 }
 0x1ef   : > { %3218 = vmatpush3.bf16.msra.mxu0 %v3608_v24 }
 0x1f0   : > { %3219 = vmatprep.subr.bf16.mxu0 %v4151_v12 }
 0x1f1   : > { %3242 = vmatmul.mubr.bf16.vlgmr.msra.gmra.mrb[0].mxu1 %v853_v30 }
 0x1f3   : > { %3220 = vmatpush3.bf16.msra.mxu0 %v3610_v26 }
 0x1f6   : > { %3222 = vmatmul.mubr.bf16.vlgmr.msra.gmra.mrb[0].mxu0 %v853_v30 }
 0x2c4   : > { %v1057_v32 = vpop.f32.mrb[0].mxu1 }
 0x2c5   : > { %v3243_v34 = vpop.f32.mrb[1].mxu1 }
 0x2c6   : > { %v1060_v37 = vpop.f32.mrb[2].mxu1 }
 0x2c7   : > { %v1065_v39 = vpack.c.bf16 %v1060_v37, %v1057_v32  ;;  %v3244_v40 = vpop.f32.mrb[3].mxu1 }
 0x2c9   : > { %v952_v31 = vpop.f32.mrb[0].mxu0  ;;  %1067 = vst [vmem:[#allocation3 + $0x8] sm:$0xff] %v1065_v39 }
 0x2ca   : > { %v3223_v33 = vpop.f32.mrb[1].mxu0 }
 0x2cb   : > { %v955_v35 = vpop.f32.mrb[2].mxu0 }
 0x2cc   : > { %v1064_v36 = vpack.c.bf16 %v955_v35, %v952_v31  ;;  %v3224_v38 = vpop.f32.mrb[3].mxu0 }
 0x2ce   : > { %1066 = vst [vmem:[#allocation3] sm:$0xff] %v1064_v36 }
 0x2cf PF: > { %p1068_p0 = pnand %p775_p3, %p772_p12 }
 0x2d0   : > { %v4153_v41 = vmov (!%p1068_p0), 0.0  }
 0x2d1   : > { %1071 = sbr.rel (%p1068_p0) target bundleno = 728 (0x2d8), region = 136  ;;  %1072 = vst [vmem:[#allocation17] sm:$0xff] (!%p1068_p0), %v4153_v41  ;;  %1073 = vst [vmem:[#allocation17 + $0x8] sm:$0xff] (!%p1068_p0), %v4153_v41 }
 0x2d2   : > { %1074 = vst [vmem:[#allocation17 + $0x10] sm:$0xff] (!%p1068_p0), %v4153_v41  ;;  %1075 = vst [vmem:[#allocation17 + $0x18] sm:$0xff] (!%p1068_p0), %v4153_v41 }
 0x2d3   : > { %1076 = vst [vmem:[#allocation17 + $0x20] sm:$0xff] (!%p1068_p0), %v4153_v41  ;;  %1077 = vst [vmem:[#allocation17 + $0x28] sm:$0xff] (!%p1068_p0), %v4153_v41 }
 0x2d8 PF: > { %v1094_v42 = vld [vmem:[#allocation3] sm:$0xff]  ;;  %v1095_v43 = vld [vmem:[#allocation3 + $0x8] sm:$0xff]  ;;  %vm1152_vm4 = vcmask 261120   ;;  %v3612_v44 = vld [vmem:[%s4572_s18] sm:$0xff]   ;;  %s5232_s3 = sld [smem:[#allocation48_spill]]  ;;  %s5249_s25 = sld [smem:[#allocation52_spill]] (!%p773_p5) }
 0x2d9   : > { %3245 = vmatprep.subr.bf16.mxu0 %v1094_v42  ;;  %3249 = vmatprep.mubr.msk.bf16.mxu0 %vm1152_vm4, %v3612_v44  ;;  %v3613_v45 = vld [vmem:[%s4572_s18 + $0x8] sm:$0xff]   ;;  %v3614_v46 = vld [vmem:[%s4572_s18 + $0x10] sm:$0xff]   ;;  %v3615_v47 = vld [vmem:[%s4572_s18 + $0x18] sm:$0xff]   ;;  %vm4158_vm5 = vmmov (!%p773_p5), 0   ;;  %s5250_s14 = sld [smem:[#allocation53_spill]] (!%p773_p5)  ;;  %s5252_s6 = scalar_lea.vmem (!%p773_p5), [#allocation5], %s4543_s0 }
 0x2da   : > { %3246 = vmatpush3.bf16.msra.mxu0 %v1094_v42  ;;  %v3616_v48 = vld [vmem:[%s4572_s18 + $0x20] sm:$0xff]   ;;  %v3617_v49 = vld [vmem:[%s4572_s18 + $0x28] sm:$0xff]   ;;  %v3618_v50 = vld [vmem:[%s4572_s18 + $0x30] sm:$0xff]  }
 0x2db   : > { %3247 = vmatprep.subr.bf16.mxu0 %v1095_v43  ;;  %v3619_v51 = vld [vmem:[%s4572_s18 + $0x38] sm:$0xff]   ;;  %v3620_v52 = vld [vmem:[#allocation11] sm:$0xff]   ;;  %v3621_v53 = vld [vmem:[#allocation11 + $0x8] sm:$0xff]  }
 0x2dc   : > { %3421 = vmatprep.subr.bf16.mxu1 %v3620_v52  ;;  %v3622_v54 = vld [vmem:[#allocation11 + $0x10] sm:$0xff]   ;;  %v3623_v55 = vld [vmem:[#allocation11 + $0x18] sm:$0xff]   ;;  %v3624_v56 = vld [vmem:[#allocation11 + $0x20] sm:$0xff]  }
 0x2dd   : > { %3429 = vmatpush3.bf16.msra.mxu1 %v3620_v52  ;;  %v3625_v57 = vld [vmem:[#allocation11 + $0x28] sm:$0xff]   ;;  %v3626_v58 = vld [vmem:[#allocation11 + $0x30] sm:$0xff]   ;;  %v3627_v59 = vld [vmem:[#allocation11 + $0x38] sm:$0xff]  }
 0x2de   : > { %3248 = vmatpush3.bf16.msra.mxu0 %v1095_v43  ;;  %3422 = vmatprep.subr.bf16.mxu1 %v3621_v53  ;;  %v1098_v60 = vld [vmem:[%s4577_s12 + $0x10] sm:$0xff]  ;;  %v1096_v61 = vld [vmem:[%s4577_s12] sm:$0xff]  ;;  %v1099_v63 = vld [vmem:[%s4577_s12 + $0x18] sm:$0xff] }
 0x2df   : > { %3265 = vmatprep.subr.bf16.mxu0 %v3620_v52  ;;  %v1097_v2 = vld [vmem:[%s4577_s12 + $0x8] sm:$0xff]  ;;  %v1102_v14 = vld [vmem:[%s4577_s12 + $0x30] sm:$0xff]  ;;  %v1100_v16 = vld [vmem:[%s4577_s12 + $0x20] sm:$0xff] }
 0x2e0   : > { %v1103_v19 = vld [vmem:[%s4577_s12 + $0x38] sm:$0xff]  ;;  %v1101_v22 = vld [vmem:[%s4577_s12 + $0x28] sm:$0xff]  ;;  %v1106_v34 = vld [vmem:[%s4577_s12 + $0x50] sm:$0xff] }
 0x2e1   : > { %3250 = vmatmul.mubr.msk.bf16.vlgmr.msra.gmra.mrb[0].mxu0 %vm1152_vm4, %v3613_v45  ;;  %3430 = vmatpush3.bf16.msra.mxu1 %v3621_v53  ;;  %v1104_v36 = vld [vmem:[%s4577_s12 + $0x40] sm:$0xff]  ;;  %v1107_v39 = vld [vmem:[%s4577_s12 + $0x58] sm:$0xff]  ;;  %v1105_v43 = vld [vmem:[%s4577_s12 + $0x48] sm:$0xff] }
 0x2e2   : > { %3253 = vmatprep.mubr.msk.bf16.mxu0 %vm1152_vm4, %v3614_v46  ;;  %3266 = vmatpush3.bf16.msra.mxu0 %v3620_v52 }
 0x2e3   : > { %3267 = vmatprep.subr.bf16.mxu0 %v3621_v53  ;;  %3423 = vmatprep.subr.bf16.mxu1 %v3622_v54 }
 0x2e5   : > { %3431 = vmatpush3.bf16.msra.mxu1 %v3622_v54 }
 0x2e6   : > { %3268 = vmatpush3.bf16.msra.mxu0 %v3621_v53  ;;  %3424 = vmatprep.subr.bf16.mxu1 %v3623_v55 }
 0x2e7   : > { %3269 = vmatprep.subr.bf16.mxu0 %v3622_v54 }
 0x2e9   : > { %3254 = vmatmul.mubr.msk.bf16.gmra.mrb[4].mxu0 %vm1152_vm4, %v3615_v47  ;;  %3432 = vmatpush3.bf16.msra.mxu1 %v3623_v55 }
 0x2ea   : > { %3257 = vmatprep.mubr.msk.bf16.mxu0 %vm1152_vm4, %v3616_v48  ;;  %3270 = vmatpush3.bf16.msra.mxu0 %v3622_v54 }
 0x2eb   : > { %3271 = vmatprep.subr.bf16.mxu0 %v3623_v55  ;;  %3425 = vmatprep.subr.bf16.mxu1 %v3624_v56 }
 0x2ed   : > { %3433 = vmatpush3.bf16.msra.mxu1 %v3624_v56 }
 0x2ee   : > { %3272 = vmatpush3.bf16.msra.mxu0 %v3623_v55  ;;  %3426 = vmatprep.subr.bf16.mxu1 %v3625_v57 }
 0x2ef   : > { %3273 = vmatprep.subr.bf16.mxu0 %v3624_v56 }
 0x2f1   : > { %3258 = vmatmul.mubr.msk.bf16.gmra.mrb[8].mxu0 %vm1152_vm4, %v3617_v49  ;;  %3434 = vmatpush3.bf16.msra.mxu1 %v3625_v57 }
 0x2f2   : > { %3261 = vmatprep.mubr.msk.bf16.mxu0 %vm1152_vm4, %v3618_v50  ;;  %3274 = vmatpush3.bf16.msra.mxu0 %v3624_v56 }
 0x2f3   : > { %3275 = vmatprep.subr.bf16.mxu0 %v3625_v57  ;;  %3427 = vmatprep.subr.bf16.mxu1 %v3626_v58 }
 0x2f5   : > { %3435 = vmatpush3.bf16.msra.mxu1 %v3626_v58 }
 0x2f6   : > { %3276 = vmatpush3.bf16.msra.mxu0 %v3625_v57  ;;  %3428 = vmatprep.subr.bf16.mxu1 %v3627_v59 }
 0x2f7   : > { %3277 = vmatprep.subr.bf16.mxu0 %v3626_v58 }
 0x2f9   : > { %3262 = vmatmul.mubr.msk.bf16.gmra.mrb[12].mxu0 %vm1152_vm4, %v3619_v51  ;;  %3436 = vmatpush3.bf16.msra.mxu1 %v3627_v59 }
 0x2fa   : > { %3278 = vmatpush3.bf16.msra.mxu0 %v3626_v58 }
 0x2fb   : > { %3279 = vmatprep.subr.bf16.mxu0 %v3627_v59 }
 0x2fe   : > { %3280 = vmatpush3.bf16.msra.mxu0 %v3627_v59 }
 0x3b4   : > { %v3251_v62 = vpop.f32.mrb[0].mxu0 }
 0x3b5   : > { %v4638_v0 = vadd.f32 %v3251_v62, %v1098_v60  ;;  %v1211_v1 = vpop.f32.mrb[1].mxu0  ;;  %v1110_v62 = vld [vmem:[%s4577_s12 + $0x70] sm:$0xff] }
 0x3b6   : > { %v4641_v3 = vadd.f32 %v1211_v1, %v1096_v61  ;;  %v3252_v4 = vpop.f32.mrb[2].mxu0  ;;  %v1108_v1 = vld [vmem:[%s4577_s12 + $0x60] sm:$0xff] }
 0x3b7   : > { %v1276_v5 = vsub.f32 0.0, %v4638_v0  ;;  %v4644_v6 = vadd.f32 %v3252_v4, %v1099_v63  ;;  %v1214_v7 = vpop.f32.mrb[3].mxu0 }
 0x3b8   : > { %v1274_v8 = vsub.f32 0.0, %v4641_v3  ;;  %v4647_v9 = vadd.f32 %v1214_v7, %v1097_v2 }
 0x3b9   : > { %v1294_v10 = vmul.f32 1.442695, %v1276_v5  ;;  %v1277_v11 = vsub.f32 0.0, %v4644_v6  ;;  %v1111_v5 = vld [vmem:[%s4577_s12 + $0x78] sm:$0xff] }
 0x3ba   : > { %v1290_v12 = vmul.f32 1.442695, %v1274_v8  ;;  %v1275_v13 = vsub.f32 0.0, %v4647_v9 }
 0x3bb   : > { %3628 = vpow2.f32 %v1294_v10  ;;  %v1296_v15 = vmul.f32 1.442695, %v1277_v11  ;;  %v1109_v11 = vld [vmem:[%s4577_s12 + $0x68] sm:$0xff] }
 0x3bc   : > { %3630 = vpow2.f32 %v1290_v12  ;;  %v1292_v17 = vmul.f32 1.442695, %v1275_v13  ;;  %v3255_v18 = vpop.f32.mrb[4].mxu0 }
 0x3bd   : > { %3632 = vpow2.f32 %v1296_v15  ;;  %v4654_v20 = vadd.f32 %v3255_v18, %v1102_v14  ;;  %v1227_v21 = vpop.f32.mrb[5].mxu0 }
 0x3be   : > { %3634 = vpow2.f32 %v1292_v17  ;;  %v4657_v23 = vadd.f32 %v1227_v21, %v1100_v16  ;;  %v3256_v24 = vpop.f32.mrb[6].mxu0 }
 0x3bf   : > { %v1280_v25 = vsub.f32 0.0, %v4654_v20  ;;  %v4660_v26 = vadd.f32 %v3256_v24, %v1103_v19  ;;  %v1230_v27 = vpop.f32.mrb[7].mxu0 }
 0x3c0   : > { %v1278_v28 = vsub.f32 0.0, %v4657_v23  ;;  %v4663_v29 = vadd.f32 %v1230_v27, %v1101_v22 }
 0x3c1   : > { %v1302_v30 = vmul.f32 1.442695, %v1280_v25  ;;  %v1281_v31 = vsub.f32 0.0, %v4660_v26 }
 0x3c2   : > { %v1298_v32 = vmul.f32 1.442695, %v1278_v28  ;;  %v1279_v33 = vsub.f32 0.0, %v4663_v29 }
 0x3c3   : > { %3636 = vpow2.f32 %v1302_v30  ;;  %v1304_v35 = vmul.f32 1.442695, %v1281_v31 }
 0x3c4   : > { %3638 = vpow2.f32 %v1298_v32  ;;  %v1300_v37 = vmul.f32 1.442695, %v1279_v33  ;;  %v3259_v38 = vpop.f32.mrb[8].mxu0 }
 0x3c5   : > { %v3629_v40 = vpop.eup %3628  ;;  %3640 = vpow2.f32 %v1304_v35  ;;  %v4670_v41 = vadd.f32 %v3259_v38, %v1106_v34  ;;  %v1243_v42 = vpop.f32.mrb[9].mxu0 }
 0x3c6   : > { %v3631_v44 = vpop.eup %3630  ;;  %v1324_v45 = vadd.f32 1.0, %v3629_v40  ;;  %3642 = vpow2.f32 %v1300_v37  ;;  %v4673_v46 = vadd.f32 %v1243_v42, %v1104_v36  ;;  %v3260_v47 = vpop.f32.mrb[10].mxu0 }
 0x3c7   : > { %v3633_v48 = vpop.eup %3632  ;;  %v1322_v49 = vadd.f32 1.0, %v3631_v44  ;;  %v1284_v50 = vsub.f32 0.0, %v4670_v41  ;;  %v4676_v51 = vadd.f32 %v3260_v47, %v1107_v39  ;;  %v1246_v52 = vpop.f32.mrb[11].mxu0 }
 0x3c8   : > { %v3635_v53 = vpop.eup %3634  ;;  %3644 = vrcp.f32 %v1324_v45  ;;  %v1325_v54 = vadd.f32 1.0, %v3633_v48  ;;  %v1282_v55 = vsub.f32 0.0, %v4673_v46  ;;  %v4679_v56 = vadd.f32 %v1246_v52, %v1105_v43 }
 0x3c9   : > { %3646 = vrcp.f32 %v1322_v49  ;;  %v1323_v57 = vadd.f32 1.0, %v3635_v53  ;;  %v1310_v58 = vmul.f32 1.442695, %v1284_v50  ;;  %v1285_v59 = vsub.f32 0.0, %v4676_v51 }
 0x3ca   : > { %3648 = vrcp.f32 %v1325_v54  ;;  %v1306_v60 = vmul.f32 1.442695, %v1282_v55  ;;  %v1283_v61 = vsub.f32 0.0, %v4679_v56 }
 0x3cb   : > { %3650 = vrcp.f32 %v1323_v57  ;;  %v1312_v63 = vmul.f32 1.442695, %v1285_v59 }
 0x3cc   : > { %3652 = vpow2.f32 %v1310_v58  ;;  %v1308_v2 = vmul.f32 1.442695, %v1283_v61  ;;  %v3263_v4 = vpop.f32.mrb[12].mxu0 }
 0x3cd   : > { %v3637_v7 = vpop.eup %3636  ;;  %3654 = vpow2.f32 %v1306_v60  ;;  %v4686_v8 = vadd.f32 %v3263_v4, %v1110_v62  ;;  %v1259_v10 = vpop.f32.mrb[13].mxu0 }
 0x3ce   : > { %v3639_v12 = vpop.eup %3638  ;;  %v1328_v13 = vadd.f32 1.0, %v3637_v7  ;;  %3656 = vpow2.f32 %v1312_v63  ;;  %v4689_v14 = vadd.f32 %v1259_v10, %v1108_v1  ;;  %v3264_v15 = vpop.f32.mrb[14].mxu0 }
 0x3cf   : > { %v3641_v16 = vpop.eup %3640  ;;  %v1326_v17 = vadd.f32 1.0, %v3639_v12  ;;  %3658 = vpow2.f32 %v1308_v2  ;;  %v1288_v18 = vsub.f32 0.0, %v4686_v8  ;;  %v4692_v19 = vadd.f32 %v3264_v15, %v1111_v5  ;;  %v1262_v21 = vpop.f32.mrb[15].mxu0 }
 0x3d0   : > { %v3643_v22 = vpop.eup %3642  ;;  %3660 = vrcp.f32 %v1328_v13  ;;  %v1329_v24 = vadd.f32 1.0, %v3641_v16  ;;  %v1286_v25 = vsub.f32 0.0, %v4689_v14  ;;  %v4695_v27 = vadd.f32 %v1262_v21, %v1109_v11 }
 0x3d1   : > { %3662 = vrcp.f32 %v1326_v17  ;;  %v1327_v28 = vadd.f32 1.0, %v3643_v22  ;;  %v1318_v30 = vmul.f32 1.442695, %v1288_v18  ;;  %v1289_v31 = vsub.f32 0.0, %v4692_v19 }
 0x3d2   : > { %v3645_v32 = vpop.eup %3644  ;;  %3664 = vrcp.f32 %v1329_v24  ;;  %v1314_v33 = vmul.f32 1.442695, %v1286_v25  ;;  %v1287_v34 = vsub.f32 0.0, %v4695_v27 }
 0x3d3   : > { %v3647_v35 = vpop.eup %3646  ;;  %3666 = vrcp.f32 %v1327_v28  ;;  %v1320_v36 = vmul.f32 1.442695, %v1289_v31  ;;  %v1356_v40 = vmul.f32 %v3645_v32, %v4638_v0 }
 0x3d4   : > { %v3649_v37 = vpop.eup %3648  ;;  %3668 = vpow2.f32 %v1318_v30  ;;  %v1316_v38 = vmul.f32 1.442695, %v1287_v34  ;;  %v1354_v44 = vmul.f32 %v3647_v35, %v4641_v3 }
 0x3d5   : > { %v3651_v39 = vpop.eup %3650  ;;  %v1357_v42 = vmul.f32 %v3649_v37, %v4644_v6  ;;  %3670 = vpow2.f32 %v1314_v33 }
 0x3d6   : > { %v3653_v43 = vpop.eup %3652  ;;  %v1355_v45 = vmul.f32 %v3651_v39, %v4647_v9  ;;  %3672 = vpow2.f32 %v1320_v36 }
 0x3d7   : > { %v3655_v47 = vpop.eup %3654  ;;  %v1371_v48 = vpack.c.bf16 %v1357_v42, %v1356_v40  ;;  %v1332_v49 = vadd.f32 1.0, %v3653_v43  ;;  %3674 = vpow2.f32 %v1316_v38 }
 0x3d8   : > { %v3657_v50 = vpop.eup %3656  ;;  %v1330_v52 = vadd.f32 1.0, %v3655_v47  ;;  %v1370_v53 = vpack.c.bf16 %v1355_v45, %v1354_v44 }
 0x3d9   : > { %v3659_v54 = vpop.eup %3658  ;;  %3676 = vrcp.f32 %v1332_v49  ;;  %v1333_v55 = vadd.f32 1.0, %v3657_v50 }
 0x3da   : > { %v3661_v0 = vpop.eup %3660  ;;  %3678 = vrcp.f32 %v1330_v52  ;;  %v1331_v6 = vadd.f32 1.0, %v3659_v54  ;;  %3281 = vmatprep.mubr.bf16.mxu0 %v1370_v53 }
 0x3db   : > { %v3663_v57 = vpop.eup %3662  ;;  %3680 = vrcp.f32 %v1333_v55  ;;  %3282 = vmatmul.mubr.bf16.vlgmr.msra.gmra.mrb[16].mxu0 %v1371_v48  ;;  %v1360_v58 = vmul.f32 %v3661_v0, %v4654_v20 }
 0x3dc   : > { %v3665_v3 = vpop.eup %3664  ;;  %3682 = vrcp.f32 %v1331_v6  ;;  %v1358_v61 = vmul.f32 %v3663_v57, %v4657_v23 }
 0x3dd   : > { %v3667_v9 = vpop.eup %3666  ;;  %v1361_v59 = vmul.f32 %v3665_v3, %v4660_v26 }
 0x3de   : > { %v3669_v60 = vpop.eup %3668  ;;  %v1359_v62 = vmul.f32 %v3667_v9, %v4663_v29 }
 0x3df   : > { %v3671_v63 = vpop.eup %3670  ;;  %v1336_v1 = vadd.f32 1.0, %v3669_v60  ;;  %v1373_v2 = vpack.c.bf16 %v1361_v59, %v1360_v58 }
 0x3e0   : > { %v3673_v4 = vpop.eup %3672  ;;  %v1334_v5 = vadd.f32 1.0, %v3671_v63  ;;  %v1372_v7 = vpack.c.bf16 %v1359_v62, %v1358_v61  ;;  %v3717_v61 = vld [vmem:[#allocation14] sm:$0xff] (!%p773_p5)   ;;  %v3718_v63 = vld [vmem:[#allocation14 + $0x8] sm:$0xff] (!%p773_p5)  }
 0x3e1   : > { %v3675_v10 = vpop.eup %3674  ;;  %3684 = vrcp.f32 %v1336_v1  ;;  %v1337_v11 = vadd.f32 1.0, %v3673_v4  ;;  %3297 = vmatprep.subr.bf16.mxu0 (!%p773_p5), %v3717_v61  ;;  %v3719_v1 = vld [vmem:[#allocation14 + $0x10] sm:$0xff] (!%p773_p5)   ;;  %v3721_v4 = vld [vmem:[#allocation14 + $0x20] sm:$0xff] (!%p773_p5)  }
 0x3e2   : > { %3686 = vrcp.f32 %v1334_v5  ;;  %v1335_v12 = vadd.f32 1.0, %v3675_v10  ;;  %3285 = vmatprep.mubr.bf16.mxu1 %v1372_v7  ;;  %3298 = vmatpush3.bf16.msra.mxu0 (!%p773_p5), %v3717_v61  ;;  %v3722_v5 = vld [vmem:[#allocation14 + $0x28] sm:$0xff] (!%p773_p5)   ;;  %v3723_v7 = vld [vmem:[#allocation14 + $0x30] sm:$0xff] (!%p773_p5)   ;;  %v3724_v10 = vld [vmem:[#allocation14 + $0x38] sm:$0xff] (!%p773_p5)  }
 0x3e3   : > { %v3677_v20 = vpop.eup %3676  ;;  %3688 = vrcp.f32 %v1337_v11  ;;  %3286 = vmatmul.mubr.bf16.vlgmr.msra.gmra.mrb[0].mxu1 %v1373_v2  ;;  %3299 = vmatprep.subr.bf16.mxu0 (!%p773_p5), %v3718_v63  ;;  %v3720_v2 = vld [vmem:[#allocation14 + $0x18] sm:$0xff] (!%p773_p5)  }
 0x3e4   : > { %v3679_v26 = vpop.eup %3678  ;;  %3690 = vrcp.f32 %v1335_v12  ;;  %v1364_v29 = vmul.f32 %v3677_v20, %v4670_v41 }
 0x3e5   : > { %v3681_v23 = vpop.eup %3680  ;;  %v1362_v16 = vmul.f32 %v3679_v26, %v4673_v46 }
 0x3e6   : > { %v3683_v13 = vpop.eup %3682  ;;  %v1365_v15 = vmul.f32 %v3681_v23, %v4676_v51  ;;  %3300 = vmatpush3.bf16.msra.mxu0 (!%p773_p5), %v3718_v63 }
 0x3e7   : > { %v1363_v17 = vmul.f32 %v3683_v13, %v4679_v56  ;;  %v3012_v56 = vld [vmem:[%s5232_s3] ss:$0 sm:$0xff]  ;;  %3301 = vmatprep.subr.bf16.mxu0 (!%p773_p5), %v3719_v1 }
 0x3e8   : > { %v1375_v18 = vpack.c.bf16 %v1365_v15, %v1364_v29  ;;  %v3725_v15 = vld [vmem:[#allocation16] sm:$0xff] (!%p773_p5)  }
 0x3e9   : > { %v1374_v21 = vpack.c.bf16 %v1363_v17, %v1362_v16  ;;  %3329 = vmatprep.subr.bf16.mxu1 (!%p773_p5), %v3725_v15  ;;  %v4154_v16 = vmov (!%p773_p5), 0   ;;  %v4770_v17 = vld [vmem:[%s4582_s19] sm:$0xff] (!%p773_p5) }
 0x3ea   : > { %3302 = vmatpush3.bf16.msra.mxu0 (!%p773_p5), %v3719_v1  ;;  %3693 = vset.pattern.permute.xlu1 (!%p773_p5), %v4154_v16 }
 0x3eb   : > { %v3685_v22 = vpop.eup %3684  ;;  %3289 = vmatprep.mubr.bf16.mxu1 %v1374_v21  ;;  %3303 = vmatprep.subr.bf16.mxu0 (!%p773_p5), %v3720_v2  ;;  %v1550_v21 = vld [vmem:[%s4582_s19 + $0x8] sm:$0xff] (!%p773_p5) }
 0x3ec   : > { %v3687_v24 = vpop.eup %3686  ;;  %3290 = vmatmul.mubr.bf16.gmra.mrb[4].mxu1 %v1375_v18  ;;  %v1368_v30 = vmul.f32 %v3685_v22, %v4686_v8  ;;  %2015 = vperm.xlu1 (!%p773_p5), %3693, %v4770_v17   ;;  %v3726_v18 = vld [vmem:[#allocation16 + $0x8] sm:$0xff] (!%p773_p5)   ;;  %v3727_v22 = vld [vmem:[#allocation16 + $0x10] sm:$0xff] (!%p773_p5)  }
 0x3ed   : > { %v3689_v25 = vpop.eup %3688  ;;  %v1366_v41 = vmul.f32 %v3687_v24, %v4689_v14  ;;  %3330 = vmatpush3.bf16.msra.mxu1 (!%p773_p5), %v3725_v15  ;;  %v4155_v24 = vmov (!%p773_p5), 2  }
 0x3ee   : > { %v3691_v28 = vpop.eup %3690  ;;  %v1369_v31 = vmul.f32 %v3689_v25, %v4692_v19  ;;  %3304 = vmatpush3.bf16.msra.mxu0 (!%p773_p5), %v3720_v2  ;;  %3331 = vmatprep.subr.bf16.mxu1 (!%p773_p5), %v3726_v18  ;;  %v3728_v25 = vld [vmem:[#allocation16 + $0x18] sm:$0xff] (!%p773_p5)  }
 0x3ef   : > { %v1367_v51 = vmul.f32 %v3691_v28, %v4695_v27  ;;  %3305 = vmatprep.subr.bf16.mxu0 (!%p773_p5), %v3721_v4  ;;  %v3729_v28 = vld [vmem:[#allocation16 + $0x20] sm:$0xff] (!%p773_p5)  }
 0x3f0   : > { %v1377_v32 = vpack.c.bf16 %v1369_v31, %v1368_v30  ;;  %2020 = vperm.xlu1 (!%p773_p5), %3693, %v1550_v21   ;;  %v4156_v30 = vmov (!%p773_p5), 1   ;;  %v1551_v31 = vld [vmem:[%s4582_s19 + $0x10] sm:$0xff] (!%p773_p5) }
 0x3f1   : > { %v1376_v46 = vpack.c.bf16 %v1367_v51, %v1366_v41  ;;  %3332 = vmatpush3.bf16.msra.mxu1 (!%p773_p5), %v3726_v18  ;;  %3692 = vset.pattern.permute.xlu0 (!%p773_p5), %v4156_v30  ;;  %v3730_v41 = vld [vmem:[#allocation16 + $0x28] sm:$0xff] (!%p773_p5)   ;;  %v3731_v51 = vld [vmem:[#allocation16 + $0x30] sm:$0xff] (!%p773_p5)  }
 0x3f2   : > { %3306 = vmatpush3.bf16.msra.mxu0 (!%p773_p5), %v3721_v4  ;;  %3333 = vmatprep.subr.bf16.mxu1 (!%p773_p5), %v3727_v22 }
 0x3f3   : > { %3293 = vmatprep.mubr.bf16.mxu1 %v1376_v46  ;;  %3307 = vmatprep.subr.bf16.mxu0 (!%p773_p5), %v3722_v5  ;;  %v3732_v46 = vld [vmem:[#allocation16 + $0x38] sm:$0xff] (!%p773_p5)  }
 0x3f4   : > { %3294 = vmatmul.mubr.bf16.gmra.mrb[8].mxu1 %v1377_v32  ;;  %3694 = vset.pattern.permute.xlu1 (!%p773_p5), %v4155_v24  ;;  %v1552_v32 = vld [vmem:[%s4582_s19 + $0x18] sm:$0xff] (!%p773_p5) }
 0x3f5   : > { %3334 = vmatpush3.bf16.msra.mxu1 (!%p773_p5), %v3727_v22  ;;  %2194 = vperm.xlu1 (!%p773_p5), %3694, %v1550_v21  }
 0x3f6   : > { %3308 = vmatpush3.bf16.msra.mxu0 (!%p773_p5), %v3722_v5  ;;  %3335 = vmatprep.subr.bf16.mxu1 (!%p773_p5), %v3728_v25 }
 0x3f7   : > { %3309 = vmatprep.subr.bf16.mxu0 (!%p773_p5), %v3723_v7  ;;  %2110 = vperm.xlu0 (!%p773_p5), %3692, %v4770_v17  }
 0x3f9   : > { %3336 = vmatpush3.bf16.msra.mxu1 (!%p773_p5), %v3728_v25  ;;  %3695 = vset.pattern.permute.xlu1 (!%p773_p5), %v4156_v30 }
 0x3fa   : > { %3310 = vmatpush3.bf16.msra.mxu0 (!%p773_p5), %v3723_v7  ;;  %3337 = vmatprep.subr.bf16.mxu1 (!%p773_p5), %v3729_v28 }
 0x3fb   : > { %3311 = vmatprep.subr.bf16.mxu0 (!%p773_p5), %v3724_v10  ;;  %2118 = vperm.xlu1 (!%p773_p5), %3695, %v1551_v31  }
 0x3fc   : > { %2114 = vperm.xlu0 (!%p773_p5), %3692, %v1550_v21  }
 0x3fd   : > { %3338 = vmatpush3.bf16.msra.mxu1 (!%p773_p5), %v3729_v28 }
 0x3fe   : > { %3312 = vmatpush3.bf16.msra.mxu0 (!%p773_p5), %v3724_v10  ;;  %3339 = vmatprep.subr.bf16.mxu1 (!%p773_p5), %v3730_v41 }
 0x3ff   : > { %3696 = vset.pattern.permute.xlu1 (!%p773_p5), %v4154_v16 }
 0x400   : > { %2025 = vperm.xlu1 (!%p773_p5), %3696, %v1551_v31   ;;  %2122 = vperm.xlu0 (!%p773_p5), %3692, %v1552_v32  }
 0x401   : > { %3340 = vmatpush3.bf16.msra.mxu1 (!%p773_p5), %v3730_v41 }
 0x402   : > { %3341 = vmatprep.subr.bf16.mxu1 (!%p773_p5), %v3731_v51 }
 0x404   : > { %2030 = vperm.xlu1 (!%p773_p5), %3696, %v1552_v32  }
 0x405   : > { %3342 = vmatpush3.bf16.msra.mxu1 (!%p773_p5), %v3731_v51 }
 0x406   : > { %3343 = vmatprep.subr.bf16.mxu1 (!%p773_p5), %v3732_v46 }
 0x408   : > { %3697 = vset.pattern.permute.xlu1 (!%p773_p5), %v4155_v24 }
 0x409   : > { %3344 = vmatpush3.bf16.msra.mxu1 (!%p773_p5), %v3732_v46  ;;  %2202 = vperm.xlu1 (!%p773_p5), %3697, %v1552_v32  }
 0x40d   : > { %3698 = vset.pattern.permute.xlu1 (!%p773_p5), %v4156_v30 }
 0x4ae   : > { %v3283_v33 = vpop.f32.mrb[16].mxu0 }
 0x4af   : > { %v4718_v34 = vadd.f32 %v3283_v33, %v3012_v56  ;;  %v1483_v35 = vpop.f32.mrb[17].mxu0  ;;  %v1554_v33 = vld [vmem:[%s4582_s19 + $0x28] sm:$0xff] (!%p773_p5) }
 0x4b0   : > { %v4720_v36 = vadd.f32 %v3012_v56, %v1483_v35  ;;  %v3284_v8 = vpop.f32.mrb[18].mxu0  ;;  %2130 = vperm.xlu0 (!%p773_p5), %3692, %v1554_v33   ;;  %v1555_v35 = vld [vmem:[%s4582_s19 + $0x30] sm:$0xff] (!%p773_p5) }
 0x4b1   : > { %5233 = vst [vmem:[#allocation23_spill] sm:$0xff] %v4718_v34  ;;  %v4722_v19 = vadd.f32 %v3284_v8, %v3012_v56  ;;  %v1486_v14 = vpop.f32.mrb[19].mxu0  ;;  %v1556_v8 = vld [vmem:[%s4582_s19 + $0x38] sm:$0xff] (!%p773_p5) }
 0x4b2   : > { %5234 = vst [vmem:[#allocation24_spill] sm:$0xff] %v4720_v36  ;;  %v4724_v37 = vadd.f32 %v3012_v56, %v1486_v14  ;;  %v1558_v14 = vld [vmem:[%s4582_s19 + $0x48] sm:$0xff] (!%p773_p5) }
 0x4b3   : > { %5235 = vst [vmem:[#allocation25_spill] sm:$0xff] %v4722_v19  ;;  %v1566_v11 = vpack.c.bf16 (!%p773_p5), %v4722_v19, %v4718_v34 }
 0x4b4   : > { %5236 = vst [vmem:[#allocation26_spill] sm:$0xff] %v4724_v37  ;;  %v1565_v62 = vpack.c.bf16 (!%p773_p5), %v4724_v37, %v4720_v36  ;;  %2138 = vperm.xlu0 (!%p773_p5), %3692, %v1556_v8  }
 0x4b6   : > { %v3287_v27 = vpop.f32.mrb[0].mxu1  ;;  %3313 = vmatprep.mubr.bf16.mxu0 (!%p773_p5), %v1565_v62 }
 0x4b7   : > { %v4726_v38 = vadd.f32 %v3287_v27, %v3012_v56  ;;  %v1499_v39 = vpop.f32.mrb[1].mxu1  ;;  %3314 = vmatmul.mubr.bf16.vlgmr.msra.gmra.mrb[0].mxu0 (!%p773_p5), %v1566_v11  ;;  %v1560_v27 = vld [vmem:[%s4582_s19 + $0x58] sm:$0xff] (!%p773_p5) }
 0x4b8   : > { %v4728_v40 = vadd.f32 %v3012_v56, %v1499_v39  ;;  %v3288_v42 = vpop.f32.mrb[2].mxu1  ;;  %2146 = vperm.xlu0 (!%p773_p5), %3692, %v1558_v14   ;;  %v1562_v39 = vld [vmem:[%s4582_s19 + $0x68] sm:$0xff] (!%p773_p5) }
 0x4b9   : > { %5237 = vst [vmem:[#allocation27_spill] sm:$0xff] %v4726_v38  ;;  %v4730_v43 = vadd.f32 %v3288_v42, %v3012_v56  ;;  %v1502_v44 = vpop.f32.mrb[3].mxu1  ;;  %v1557_v42 = vld [vmem:[%s4582_s19 + $0x40] sm:$0xff] (!%p773_p5) }
 0x4ba   : > { %5238 = vst [vmem:[#allocation28_spill] sm:$0xff] %v4728_v40  ;;  %v4732_v45 = vadd.f32 %v3012_v56, %v1502_v44  ;;  %v4798_v44 = vld [vmem:[%s4582_s19 + $0x78] sm:$0xff] (!%p773_p5) }
 0x4bb   : > { %5239 = vst [vmem:[#allocation29_spill] sm:$0xff] %v4730_v43  ;;  %v1568_v20 = vpack.c.bf16 (!%p773_p5), %v4730_v43, %v4726_v38 }
 0x4bc   : > { %5240 = vst [vmem:[#allocation30_spill] sm:$0xff] %v4732_v45  ;;  %v1567_v12 = vpack.c.bf16 (!%p773_p5), %v4732_v45, %v4728_v40  ;;  %2154 = vperm.xlu0 (!%p773_p5), %3692, %v1560_v27  }
 0x4be   : > { %3317 = vmatprep.mubr.bf16.mxu0 (!%p773_p5), %v1567_v12 }
 0x4bf   : > { %v3291_v47 = vpop.f32.mrb[4].mxu1  ;;  %3318 = vmatmul.mubr.bf16.gmra.mrb[4].mxu0 (!%p773_p5), %v1568_v20 }
 0x4c0   : > { %v4734_v48 = vadd.f32 %v3291_v47, %v3012_v56  ;;  %v1515_v49 = vpop.f32.mrb[5].mxu1  ;;  %2162 = vperm.xlu0 (!%p773_p5), %3692, %v1562_v39   ;;  %v1559_v47 = vld [vmem:[%s4582_s19 + $0x50] sm:$0xff] (!%p773_p5) }
 0x4c1   : > { %v4736_v50 = vadd.f32 %v3012_v56, %v1515_v49  ;;  %v3292_v52 = vpop.f32.mrb[6].mxu1  ;;  %v1561_v49 = vld [vmem:[%s4582_s19 + $0x60] sm:$0xff] (!%p773_p5) }
 0x4c2   : > { %5241 = vst [vmem:[#allocation31_spill] sm:$0xff] %v4734_v48  ;;  %v4738_v53 = vadd.f32 %v3292_v52, %v3012_v56  ;;  %v1518_v54 = vpop.f32.mrb[7].mxu1  ;;  %v1563_v52 = vld [vmem:[%s4582_s19 + $0x70] sm:$0xff] (!%p773_p5) }
 0x4c3   : > { %5242 = vst [vmem:[#allocation32_spill] sm:$0xff] %v4736_v50  ;;  %v4740_v55 = vadd.f32 %v3012_v56, %v1518_v54  ;;  %v4817_v54 = vld [vmem:[%s5249_s25] ss:$0 sm:$0xff] (!%p773_p5) }
 0x4c4   : > { %5243 = vst [vmem:[#allocation33_spill] sm:$0xff] %v4738_v53  ;;  %v1570_v23 = vpack.c.bf16 (!%p773_p5), %v4738_v53, %v4734_v48  ;;  %2170 = vperm.xlu0 (!%p773_p5), %3692, %v4798_v44  }
 0x4c5   : > { %5244 = vst [vmem:[#allocation34_spill] sm:$0xff] %v4740_v55  ;;  %v1569_v26 = vpack.c.bf16 (!%p773_p5), %v4740_v55, %v4736_v50 }
 0x4c7   : > { %v3295_v0 = vpop.f32.mrb[8].mxu1  ;;  %1548 = sbr.rel (%p773_p5) target bundleno = 1929 (0x789), region = 140  ;;  %3321 = vmatprep.mubr.bf16.mxu0 (!%p773_p5), %v1569_v26 }
 0x4c8   : > { %v4742_v6 = vadd.f32 %v3295_v0, %v3012_v56  ;;  %v1531_v57 = vpop.f32.mrb[9].mxu1  ;;  %3322 = vmatmul.mubr.bf16.gmra.mrb[8].mxu0 (!%p773_p5), %v1570_v23  ;;  %3714 = vset.pattern.permute.xlu0 (!%p773_p5), %v4155_v24 }
 0x4c9   : > { %v4744_v3 = vadd.f32 %v3012_v56, %v1531_v57  ;;  %v3296_v9 = vpop.f32.mrb[10].mxu1  ;;  %2190 = vperm.xlu0 (!%p773_p5), %3714, %v4770_v17  }
 0x4ca   : > { %5245 = vst [vmem:[#allocation35_spill] sm:$0xff] %v4742_v6  ;;  %v4746_v58 = vadd.f32 %v3296_v9, %v3012_v56  ;;  %v1534_v59 = vpop.f32.mrb[11].mxu1 }
 0x4cb   : > { %5246 = vst [vmem:[#allocation36_spill] sm:$0xff] %v4744_v3  ;;  %v4748_v60 = vadd.f32 %v3012_v56, %v1534_v59  ;;  %v1553_v56 = vld [vmem:[%s4582_s19 + $0x20] sm:$0xff] (!%p773_p5) }
 0x4cc   : > { %5247 = vst [vmem:[#allocation37_spill] sm:$0xff] %v4746_v58  ;;  %v1572_v29 = vpack.c.bf16 (!%p773_p5), %v4746_v58, %v4742_v6  ;;  %2126 = vperm.xlu1 (!%p773_p5), %3698, %v1553_v56  }
 0x4cd   : > { %5248 = vst [vmem:[#allocation38_spill] sm:$0xff] %v4748_v60  ;;  %v1571_v13 = vpack.c.bf16 (!%p773_p5), %v4748_v60, %v4744_v3  ;;  %2198 = vperm.xlu0 (!%p773_p5), %3714, %v1551_v31  }
 0x4cf   : > { %3325 = vmatprep.mubr.bf16.mxu0 %v1571_v13 }
 0x4d0   : > { %3326 = vmatmul.mubr.bf16.gmra.mrb[12].mxu0 %v1572_v29  ;;  %3699 = vset.pattern.permute.xlu1 %v4154_v16 }
 0x4d1   : > { %2339 = vmatprep.mubr.bf16.mxu0 %v4154_v16  ;;  %2035 = vperm.xlu1 %3699, %v1553_v56  }
 0x4d2   : > { %2206 = vperm.xlu0 %3714, %v1553_v56  }
 0x4d5   : > { %2040 = vperm.xlu1 %3699, %v1554_v33  }
 0x4d6   : > { %2214 = vperm.xlu0 %3714, %v1555_v35  }
 0x4d9   : > { %3700 = vset.pattern.permute.xlu1 %v4155_v24 }
 0x4da   : > { %2210 = vperm.xlu1 %3700, %v1554_v33   ;;  %2222 = vperm.xlu0 %3714, %v1557_v42  }
 0x4de   : > { %3701 = vset.pattern.permute.xlu1 %v4156_v30  ;;  %2230 = vperm.xlu0 %3714, %v1559_v47  }
 0x4df   : > { %2134 = vperm.xlu1 %3701, %v1555_v35  }
 0x4e2   : > { %2238 = vperm.xlu0 %3714, %v1561_v49  }
 0x4e3   : > { %3702 = vset.pattern.permute.xlu1 %v4154_v16 }
 0x4e4   : > { %2045 = vperm.xlu1 %3702, %v1555_v35  }
 0x4e6   : > { %2246 = vperm.xlu0 %3714, %v1563_v52  }
 0x4e8   : > { %2050 = vperm.xlu1 %3702, %v1556_v8  }
 0x4ec   : > { %3703 = vset.pattern.permute.xlu1 %v4155_v24 }
 0x4ed   : > { %2218 = vperm.xlu1 %3703, %v1556_v8  }
 0x4f1   : > { %3704 = vset.pattern.permute.xlu1 %v4156_v30 }
 0x4f2   : > { %2142 = vperm.xlu1 %3704, %v1557_v42  }
 0x4f6   : > { %3705 = vset.pattern.permute.xlu1 %v4154_v16 }
 0x4f7   : > { %2055 = vperm.xlu1 %3705, %v1557_v42  }
 0x4fb   : > { %2060 = vperm.xlu1 %3705, %v1558_v14  }
 0x4ff   : > { %3706 = vset.pattern.permute.xlu1 %v4155_v24 }
 0x500   : > { %2226 = vperm.xlu1 %3706, %v1558_v14  }
 0x504   : > { %3707 = vset.pattern.permute.xlu1 %v4156_v30 }
 0x505   : > { %2150 = vperm.xlu1 %3707, %v1559_v47  }
 0x509   : > { %3708 = vset.pattern.permute.xlu1 %v4154_v16 }
 0x50a   : > { %2065 = vperm.xlu1 %3708, %v1559_v47  }
 0x50e   : > { %2070 = vperm.xlu1 %3708, %v1560_v27  }
 0x512   : > { %3709 = vset.pattern.permute.xlu1 %v4155_v24 }
 0x513   : > { %2234 = vperm.xlu1 %3709, %v1560_v27  }
 0x517   : > { %3710 = vset.pattern.permute.xlu1 %v4156_v30 }
 0x518   : > { %2158 = vperm.xlu1 %3710, %v1561_v49  }
 0x51c   : > { %3711 = vset.pattern.permute.xlu1 %v4154_v16 }
 0x51d   : > { %2075 = vperm.xlu1 %3711, %v1561_v49  }
 0x521   : > { %2080 = vperm.xlu1 %3711, %v1562_v39  }
 0x525   : > { %3712 = vset.pattern.permute.xlu1 %v4155_v24 }
 0x526   : > { %2242 = vperm.xlu1 %3712, %v1562_v39  }
 0x52a   : > { %3713 = vset.pattern.permute.xlu1 %v4156_v30 }
 0x52b   : > { %2166 = vperm.xlu1 %3713, %v1563_v52  }
 0x52f   : > { %3715 = vset.pattern.permute.xlu1 %v4154_v16 }
 0x530   : > { %2085 = vperm.xlu1 %3715, %v1563_v52  }
 0x534   : > { %2090 = vperm.xlu1 %3715, %v4798_v44  }
 0x538   : > { %3716 = vset.pattern.permute.xlu1 %v4155_v24 }
 0x539   : > { %2250 = vperm.xlu1 %3716, %v4798_v44  }
 0x58a   : > { %v3315_v0 = vpop.f32.mrb[0].mxu0 }
 0x58b   : > { %v4820_v57 = vadd.f32 %v3315_v0, %v4817_v54  ;;  %v1678_v9 = vpop.f32.mrb[1].mxu0 }
 0x58c   : > { %v4823_v59 = vadd.f32 %v4817_v54, %v1678_v9  ;;  %v3316_v61 = vpop.f32.mrb[2].mxu0 }
 0x58d   : > { %v1743_v62 = vsub.f32 0.0, %v4820_v57  ;;  %v4827_v63 = vadd.f32 %v3316_v61, %v4817_v54  ;;  %v1681_v1 = vpop.f32.mrb[3].mxu0 }
 0x58e   : > { %v1741_v2 = vsub.f32 0.0, %v4823_v59  ;;  %v4831_v4 = vadd.f32 %v4817_v54, %v1681_v1 }
 0x58f   : > { %v1761_v5 = vmul.f32 1.442695, %v1743_v62  ;;  %v1744_v7 = vsub.f32 0.0, %v4827_v63 }
 0x590   : > { %v1757_v10 = vmul.f32 1.442695, %v1741_v2  ;;  %v1742_v11 = vsub.f32 0.0, %v4831_v4 }
 0x591   : > { %3734 = vpow2.f32 %v1761_v5  ;;  %v1763_v12 = vmul.f32 1.442695, %v1744_v7 }
 0x592   : > { %3736 = vpow2.f32 %v1757_v10  ;;  %v1759_v20 = vmul.f32 1.442695, %v1742_v11  ;;  %v3319_v26 = vpop.f32.mrb[4].mxu0 }
 0x593   : > { %3738 = vpow2.f32 %v1763_v12  ;;  %v4837_v23 = vadd.f32 %v3319_v26, %v4817_v54  ;;  %v1694_v13 = vpop.f32.mrb[5].mxu0 }
 0x594   : > { %3740 = vpow2.f32 %v1759_v20  ;;  %v4841_v29 = vadd.f32 %v4817_v54, %v1694_v13  ;;  %v3320_v15 = vpop.f32.mrb[6].mxu0 }
 0x595   : > { %v1747_v17 = vsub.f32 0.0, %v4837_v23  ;;  %v4845_v18 = vadd.f32 %v3320_v15, %v4817_v54  ;;  %v1697_v21 = vpop.f32.mrb[7].mxu0 }
 0x596   : > { %v1745_v22 = vsub.f32 0.0, %v4841_v29  ;;  %v4849_v25 = vadd.f32 %v4817_v54, %v1697_v21 }
 0x597   : > { %v1769_v28 = vmul.f32 1.442695, %v1747_v17  ;;  %v1748_v30 = vsub.f32 0.0, %v4845_v18 }
 0x598   : > { %v1765_v31 = vmul.f32 1.442695, %v1745_v22  ;;  %v1746_v41 = vsub.f32 0.0, %v4849_v25 }
 0x599   : > { %3742 = vpow2.f32 %v1769_v28  ;;  %v1771_v51 = vmul.f32 1.442695, %v1748_v30 }
 0x59a   : > { %3744 = vpow2.f32 %v1765_v31  ;;  %v1767_v32 = vmul.f32 1.442695, %v1746_v41 }
 0x59b   : > { %v3323_v46 = vpop.f32.mrb[8].mxu0  ;;  %v3735_v56 = vpop.eup %3734  ;;  %3746 = vpow2.f32 %v1771_v51 }
 0x59c   : > { %v4855_v33 = vadd.f32 %v3323_v46, %v4817_v54  ;;  %v1710_v35 = vpop.f32.mrb[9].mxu0  ;;  %v3737_v8 = vpop.eup %3736  ;;  %v1791_v14 = vadd.f32 1.0, %v3735_v56  ;;  %3748 = vpow2.f32 %v1767_v32 }
 0x59d   : > { %v4858_v27 = vadd.f32 %v4817_v54, %v1710_v35  ;;  %v3324_v39 = vpop.f32.mrb[10].mxu0  ;;  %v3739_v16 = vpop.eup %3738  ;;  %v1789_v42 = vadd.f32 1.0, %v3737_v8 }
 0x59e   : > { %v1751_v47 = vsub.f32 0.0, %v4855_v33  ;;  %v4862_v49 = vadd.f32 %v3324_v39, %v4817_v54  ;;  %v1713_v52 = vpop.f32.mrb[11].mxu0  ;;  %v3741_v0 = vpop.eup %3740  ;;  %3750 = vrcp.f32 %v1791_v14  ;;  %v1792_v9 = vadd.f32 1.0, %v3739_v16 }
 0x59f   : > { %v1749_v61 = vsub.f32 0.0, %v4858_v27  ;;  %v4867_v62 = vadd.f32 %v4817_v54, %v1713_v52  ;;  %3752 = vrcp.f32 %v1789_v42  ;;  %v1790_v1 = vadd.f32 1.0, %v3741_v0 }
 0x5a0   : > { %v1777_v2 = vmul.f32 1.442695, %v1751_v47  ;;  %v1752_v5 = vsub.f32 0.0, %v4862_v49  ;;  %3754 = vrcp.f32 %v1792_v9 }
 0x5a1   : > { %v1773_v7 = vmul.f32 1.442695, %v1749_v61  ;;  %v1750_v10 = vsub.f32 0.0, %v4867_v62  ;;  %3756 = vrcp.f32 %v1790_v1 }
 0x5a2   : > { %v1779_v11 = vmul.f32 1.442695, %v1752_v5  ;;  %3758 = vpow2.f32 %v1777_v2 }
 0x5a3   : > { %v1775_v12 = vmul.f32 1.442695, %v1750_v10  ;;  %v3327_v20 = vpop.f32.mrb[12].mxu0  ;;  %v3743_v26 = vpop.eup %3742  ;;  %3760 = vpow2.f32 %v1773_v7 }
 0x5a4   : > { %v4874_v13 = vadd.f32 %v3327_v20, %v4817_v54  ;;  %v1726_v15 = vpop.f32.mrb[13].mxu0  ;;  %v3745_v17 = vpop.eup %3744  ;;  %v1795_v21 = vadd.f32 1.0, %v3743_v26  ;;  %3762 = vpow2.f32 %v1779_v11 }
 0x5a5   : > { %v4877_v22 = vadd.f32 %v4817_v54, %v1726_v15  ;;  %v3328_v28 = vpop.f32.mrb[14].mxu0  ;;  %v3747_v30 = vpop.eup %3746  ;;  %v1793_v24 = vadd.f32 1.0, %v3745_v17  ;;  %3764 = vpow2.f32 %v1775_v12 }
 0x5a6   : > { %v1755_v31 = vsub.f32 0.0, %v4874_v13  ;;  %v4881_v44 = vadd.f32 %v3328_v28, %v4817_v54  ;;  %v1729_v41 = vpop.f32.mrb[15].mxu0  ;;  %v3749_v51 = vpop.eup %3748  ;;  %3766 = vrcp.f32 %v1795_v21  ;;  %v1796_v32 = vadd.f32 1.0, %v3747_v30 }
 0x5a7   : > { %v1753_v46 = vsub.f32 0.0, %v4877_v22  ;;  %v4885_v56 = vadd.f32 %v4817_v54, %v1729_v41  ;;  %3768 = vrcp.f32 %v1793_v24  ;;  %v1794_v35 = vadd.f32 1.0, %v3749_v51 }
 0x5a8   : > { %v1785_v8 = vmul.f32 1.442695, %v1755_v31  ;;  %v1756_v14 = vsub.f32 0.0, %v4881_v44  ;;  %v3751_v39 = vpop.eup %3750  ;;  %3770 = vrcp.f32 %v1796_v32 }
 0x5a9   : > { %v1781_v16 = vmul.f32 1.442695, %v1753_v46  ;;  %v1754_v42 = vsub.f32 0.0, %v4885_v56  ;;  %v3753_v47 = vpop.eup %3752  ;;  %3772 = vrcp.f32 %v1794_v35  ;;  %v1823_v54 = vmul.f32 %v3751_v39, %v4820_v57 }
 0x5aa   : > { %v1787_v52 = vmul.f32 1.442695, %v1756_v14  ;;  %v3755_v0 = vpop.eup %3754  ;;  %3774 = vpow2.f32 %v1785_v8  ;;  %v1821_v5 = vmul.f32 %v3753_v47, %v4823_v59 }
 0x5ab   : > { %v1783_v9 = vmul.f32 1.442695, %v1754_v42  ;;  %v3757_v61 = vpop.eup %3756  ;;  %v1824_v1 = vmul.f32 %v3755_v0, %v4827_v63  ;;  %3776 = vpow2.f32 %v1781_v16 }
 0x5ac   : > { %v3759_v2 = vpop.eup %3758  ;;  %3778 = vpow2.f32 %v1787_v52  ;;  %v1822_v7 = vmul.f32 %v3757_v61, %v4831_v4 }
 0x5ad   : > { %v3761_v10 = vpop.eup %3760  ;;  %v1799_v11 = vadd.f32 1.0, %v3759_v2  ;;  %3780 = vpow2.f32 %v1783_v9  ;;  %v1838_v12 = vpack.c.bf16 %v1824_v1, %v1823_v54 }
 0x5ae   : > { %v3763_v20 = vpop.eup %3762  ;;  %v1797_v26 = vadd.f32 1.0, %v3761_v10  ;;  %v1837_v15 = vpack.c.bf16 %v1822_v7, %v1821_v5 }
 0x5af   : > { %v3765_v17 = vpop.eup %3764  ;;  %3782 = vrcp.f32 %v1799_v11  ;;  %v1800_v21 = vadd.f32 1.0, %v3763_v20 }
 0x5b0   : > { %v3767_v57 = vpop.eup %3766  ;;  %3784 = vrcp.f32 %v1797_v26  ;;  %v1798_v63 = vadd.f32 1.0, %v3765_v17  ;;  %3345 = vmatprep.mubr.bf16.mxu1 %v1837_v15 }
 0x5b1   : > { %v3769_v28 = vpop.eup %3768  ;;  %3786 = vrcp.f32 %v1800_v21  ;;  %3346 = vmatmul.mubr.bf16.vlgmr.msra.gmra.mrb[0].mxu1 %v1838_v12  ;;  %v1827_v30 = vmul.f32 %v3767_v57, %v4837_v23  ;;  %v5179_v57 = vmov 0.0  }
 0x5b2   : > { %v3771_v59 = vpop.eup %3770  ;;  %3788 = vrcp.f32 %v1798_v63  ;;  %v1825_v41 = vmul.f32 %v3769_v28, %v4841_v29  ;;  %3361 = vmatprep.subr.bf16.mxu1 %v5179_v57 }
 0x5b3   : > { %v3773_v4 = vpop.eup %3772  ;;  %v1828_v24 = vmul.f32 %v3771_v59, %v4845_v18 }
 0x5b4   : > { %v3775_v31 = vpop.eup %3774  ;;  %v1826_v51 = vmul.f32 %v3773_v4, %v4849_v25 }
 0x5b5   : > { %v3777_v32 = vpop.eup %3776  ;;  %v1803_v46 = vadd.f32 1.0, %v3775_v31  ;;  %v1840_v35 = vpack.c.bf16 %v1828_v24, %v1827_v30  ;;  %v2111_v24 = vpop.permute.xlu0 %2110 }
 0x5b6   : > { %v3779_v8 = vpop.eup %3778  ;;  %v1801_v14 = vadd.f32 1.0, %v3777_v32  ;;  %v1839_v39 = vpack.c.bf16 %v1826_v51, %v1825_v41 }
 0x5b7   : > { %v3781_v16 = vpop.eup %3780  ;;  %3790 = vrcp.f32 %v1803_v46  ;;  %v1804_v42 = vadd.f32 1.0, %v3779_v8 }
 0x5b8   : > { %3792 = vrcp.f32 %v1801_v14  ;;  %v1802_v47 = vadd.f32 1.0, %v3781_v16  ;;  %3349 = vmatprep.mubr.bf16.mxu1 %v1839_v39 }
 0x5b9   : > { %v3783_v23 = vpop.eup %3782  ;;  %3794 = vrcp.f32 %v1804_v42  ;;  %3350 = vmatmul.mubr.bf16.gmra.mrb[4].mxu1 %v1840_v35  ;;  %v2115_v41 = vpop.permute.xlu0 %2114 }
 0x5ba   : > { %v3785_v18 = vpop.eup %3784  ;;  %3796 = vrcp.f32 %v1802_v47  ;;  %v1831_v25 = vmul.f32 %v3783_v23, %v4855_v33 }
 0x5bb   : > { %v3787_v29 = vpop.eup %3786  ;;  %v1829_v9 = vmul.f32 %v3785_v18, %v4858_v27 }
 0x5bc   : > { %v3789_v52 = vpop.eup %3788  ;;  %v1832_v0 = vmul.f32 %v3787_v29, %v4862_v49 }
 0x5bd   : > { %v1830_v61 = vmul.f32 %v3789_v52, %v4867_v62  ;;  %v2016_v62 = vpop.permute.xlu1 %2015  ;;  %v2123_v32 = vpop.permute.xlu0 %2122 }
 0x5be   : > { %v1842_v54 = vpack.c.bf16 %v1832_v0, %v1831_v25 }
 0x5bf   : > { %v1841_v1 = vpack.c.bf16 %v1830_v61, %v1829_v9 }
 0x5c1   : > { %v3791_v2 = vpop.eup %3790  ;;  %3353 = vmatprep.mubr.bf16.mxu1 %v1841_v1  ;;  %v2021_v26 = vpop.permute.xlu1 %2020 }
 0x5c2   : > { %v3793_v5 = vpop.eup %3792  ;;  %3354 = vmatmul.mubr.bf16.gmra.mrb[8].mxu1 %v1842_v54  ;;  %v1835_v11 = vmul.f32 %v3791_v2, %v4874_v13  ;;  %v4927_v35 = vpop.permute.xlu0 %2130 }
 0x5c3   : > { %v3795_v7 = vpop.eup %3794  ;;  %v1833_v33 = vmul.f32 %v3793_v5, %v4877_v22  ;;  %v4960_v5 = vld [vmem:[%s5250_s14] ss:$0 sm:$0xff] }
 0x5c4   : > { %v3797_v10 = vpop.eup %3796  ;;  %v1836_v12 = vmul.f32 %v3795_v7, %v4881_v44 }
 0x5c5   : > { %v1834_v49 = vmul.f32 %v3797_v10, %v4885_v56  ;;  %v2195_v15 = vpop.permute.xlu1 %2194 }
 0x5c6   : > { %v1844_v20 = vpack.c.bf16 %v1836_v12, %v1835_v11  ;;  %v4933_v39 = vpop.permute.xlu0 %2138 }
 0x5c7   : > { %v1843_v27 = vpack.c.bf16 %v1834_v49, %v1833_v33 }
 0x5c9   : > { %3357 = vmatprep.mubr.bf16.mxu1 %v1843_v27  ;;  %v2119_v17 = vpop.permute.xlu1 %2118 }
 0x5ca   : > { %3358 = vmatmul.mubr.bf16.gmra.mrb[12].mxu1 %v1844_v20  ;;  %v4937_v42 = vpop.permute.xlu0 %2146 }
 0x5cb   : > { %3377 = vmatprep.mubr.msk.bf16.mxu1 %vm4158_vm5, %v5179_v57 }
 0x5cd   : > { %v2026_v21 = vpop.permute.xlu1 %2025 }
 0x5ce   : > { %v4941_v23 = vpop.permute.xlu0 %2154 }
 0x5d1   : > { %v2031_v63 = vpop.permute.xlu1 %2030 }
 0x5d2   : > { %v4945_v29 = vpop.permute.xlu0 %2162 }
 0x5d5   : > { %v2203_v13 = vpop.permute.xlu1 %2202 }
 0x5d6   : > { %v4949_v25 = vpop.permute.xlu0 %2170 }
 0x5d9   : > { %v4906_v28 = vpop.permute.xlu1 %2126 }
 0x5da   : > { %v2191_v9 = vpop.permute.xlu0 %2190 }
 0x5dd   : > { %v4908_v44 = vpop.permute.xlu1 %2035 }
 0x5de   : > { %v2199_v54 = vpop.permute.xlu0 %2198 }
 0x5e1   : > { %v4910_v22 = vpop.permute.xlu1 %2040 }
 0x5e2   : > { %v2207_v2 = vpop.permute.xlu0 %2206 }
 0x5e5   : > { %v4912_v56 = vpop.permute.xlu1 %2210 }
 0x5e6   : > { %v2215_v58 = vpop.permute.xlu0 %2214 }
 0x5e9   : > { %v4915_v59 = vpop.permute.xlu1 %2134 }
 0x5ed   : > { %v4917_v4 = vpop.permute.xlu1 %2045 }
 0x5f1   : > { %v4919_v30 = vpop.permute.xlu1 %2050 }
 0x5f5   : > { %v4921_v31 = vpop.permute.xlu1 %2218 }
 0x5f9   : > { %v4923_v51 = vpop.permute.xlu1 %2142 }
 0x5fd   : > { %v4925_v46 = vpop.permute.xlu1 %2055 }
 0x601   : > { %v4929_v8 = vpop.permute.xlu1 %2060 }
 0x605   : > { %v4931_v14 = vpop.permute.xlu1 %2226 }
 0x609   : > { %v4935_v16 = vpop.permute.xlu1 %2150 }
 0x60d   : > { %v4939_v47 = vpop.permute.xlu1 %2065 }
 0x611   : > { %v4943_v18 = vpop.permute.xlu1 %2070 }
 0x615   : > { %v4947_v52 = vpop.permute.xlu1 %2234 }
 0x619   : > { %v4951_v0 = vpop.permute.xlu1 %2158 }
 0x61d   : > { %v4953_v61 = vpop.permute.xlu1 %2075 }
 0x621   : > { %v4955_v1 = vpop.permute.xlu1 %2080 }
 0x625   : > { %v4965_v57 = vpop.permute.xlu1 %2242 }
 0x684   : > { %v3347_v7 = vpop.f32.mrb[0].mxu1 }
 0x685   : > { %v1959_v10 = vadd.f32 %v3347_v7, %v4960_v5  ;;  %v1950_v11 = vpop.f32.mrb[1].mxu1 }
 0x686   : > { %v1951_v12 = vadd.f32 %v4960_v5, %v1950_v11  ;;  %v3348_v33 = vpop.f32.mrb[2].mxu1 }
 0x687   : > { %v2095_v49 = vmul.f32 %v2026_v21, %v1959_v10  ;;  %v1962_v20 = vadd.f32 %v3348_v33, %v4960_v5  ;;  %v1953_v27 = vpop.f32.mrb[3].mxu1  ;;  %v2175_v6 = vmul.f32 %v2119_v17, %v1959_v10  ;;  %v2255_v60 = vmul.f32 %v2199_v54, %v1959_v10  ;;  %v4969_v54 = vpop.permute.xlu1 %2166 }
 0x688   : > { %v2093_v3 = vmul.f32 %v2016_v62, %v1951_v12  ;;  %v1954_v53 = vadd.f32 %v4960_v5, %v1953_v27  ;;  %v2173_v48 = vmul.f32 %v2111_v24, %v1951_v12  ;;  %v2253_v43 = vmul.f32 %v2191_v9, %v1951_v12  ;;  %v2223_v24 = vpop.permute.xlu0 %2222 }
 0x689   : > { %v2096_v55 = vmul.f32 %v2031_v63, %v1962_v20  ;;  %v2176_v50 = vmul.f32 %v2123_v32, %v1962_v20  ;;  %v2256_v7 = vmul.f32 %v2203_v13, %v1962_v20 }
 0x68a   : > { %v2094_v38 = vmul.f32 %v2021_v26, %v1954_v53  ;;  %v2174_v11 = vmul.f32 %v2115_v41, %v1954_v53  ;;  %v2254_v45 = vmul.f32 %v2195_v15, %v1954_v53 }
 0x68b   : > { %v2272_v21 = vpack.c.bf16 %v2096_v55, %v2095_v49  ;;  %v2274_v40 = vpack.c.bf16 %v2256_v7, %v2255_v60  ;;  %v2273_v33 = vpack.c.bf16 %v2176_v50, %v2175_v6 }
 0x68c   : > { %v2269_v19 = vpack.c.bf16 %v2094_v38, %v2093_v3  ;;  %v2271_v34 = vpack.c.bf16 %v2254_v45, %v2253_v43  ;;  %v3351_v37 = vpop.f32.mrb[4].mxu1  ;;  %v2270_v36 = vpack.c.bf16 %v2174_v11, %v2173_v48  ;;  %v5251_v3 = vmov 0.0  }
 0x68d   : > { %v1975_v17 = vadd.f32 %v3351_v37, %v4960_v5  ;;  %v1966_v62 = vpop.f32.mrb[5].mxu1 }
 0x68e   : > { %v1967_v63 = vadd.f32 %v4960_v5, %v1966_v62  ;;  %v3352_v13 = vpop.f32.mrb[6].mxu1  ;;  %2307 = vmatprep.subr.bf16.mxu0 %v2270_v36  ;;  %3362 = vmatpush3.bf16.msra.mxu1 %v2271_v34 }
 0x68f   : > { %v2099_v53 = vmul.f32 %v4917_v4, %v1975_v17  ;;  %v1978_v55 = vadd.f32 %v3352_v13, %v4960_v5  ;;  %v1969_v50 = vpop.f32.mrb[7].mxu1  ;;  %2308 = vmatpush1.bf16.msra.mxu0 %v2269_v19  ;;  %v2179_v38 = vmul.f32 %v4915_v59, %v1975_v17  ;;  %v2259_v43 = vmul.f32 %v2215_v58, %v1975_v17  ;;  %v2231_v4 = vpop.permute.xlu0 %2230 }
 0x690   : > { %v2097_v37 = vmul.f32 %v4908_v44, %v1967_v63  ;;  %v1970_v45 = vadd.f32 %v4960_v5, %v1969_v50  ;;  %2309 = vmatprep.subr.bf16.mxu0 %v2273_v33  ;;  %v2177_v48 = vmul.f32 %v4906_v28, %v1967_v63  ;;  %3363 = vmatprep.subr.bf16.mxu1 %v5251_v3  ;;  %v2086_v28 = vpop.permute.xlu1 %2085 }
 0x691   : > { %v2100_v6 = vmul.f32 %v4919_v30, %v1978_v55  ;;  %v2180_v34 = vmul.f32 %v4933_v39, %v1978_v55  ;;  %v2260_v36 = vmul.f32 %v4921_v31, %v1978_v55  ;;  %v2257_v60 = vmul.f32 %v2207_v2, %v1967_v63 }
 0x692   : > { %v2098_v19 = vmul.f32 %v4910_v22, %v1970_v45  ;;  %v2178_v58 = vmul.f32 %v4927_v35, %v1970_v45  ;;  %v2258_v26 = vmul.f32 %v4912_v56, %v1970_v45  ;;  %3364 = vmatpush3.bf16.msra.mxu1 %v2274_v40 }
 0x693   : > { %v2278_v15 = vpack.c.bf16 %v2100_v6, %v2099_v53  ;;  %v2280_v44 = vpack.c.bf16 %v2260_v36, %v2259_v43  ;;  %2310 = vmatpush1.bf16.msra.mxu0 %v2272_v21  ;;  %3365 = vmatprep.subr.bf16.mxu1 %v5251_v3  ;;  %v2279_v59 = vpack.c.bf16 %v2180_v34, %v2179_v38  ;;  %v2239_v11 = vpop.permute.xlu0 %2238 }
 0x694   : > { %v2275_v30 = vpack.c.bf16 %v2098_v19, %v2097_v37  ;;  %v2277_v31 = vpack.c.bf16 %v2258_v26, %v2257_v60  ;;  %v2276_v41 = vpack.c.bf16 %v2178_v58, %v2177_v48  ;;  %v2091_v7 = vpop.permute.xlu1 %2090 }
 0x695   : > { %v3355_v32 = vpop.f32.mrb[8].mxu1 }
 0x696   : > { %v1991_v39 = vadd.f32 %v3355_v32, %v4960_v5  ;;  %v1982_v22 = vpop.f32.mrb[9].mxu1  ;;  %2311 = vmatprep.subr.bf16.mxu0 %v2276_v41  ;;  %3366 = vmatpush3.bf16.msra.mxu1 %v2277_v31  ;;  %v2298_v31 = vld [vmem:[#allocation17 + $0x28] sm:$0xff] }
 0x697   : > { %v1983_v56 = vadd.f32 %v4960_v5, %v1982_v22  ;;  %v3356_v40 = vpop.f32.mrb[10].mxu1  ;;  %2312 = vmatpush1.bf16.msra.mxu0 %v2275_v30  ;;  %3367 = vmatprep.subr.bf16.mxu1 %v5251_v3  ;;  %v2294_v30 = vld [vmem:[#allocation17 + $0x8] sm:$0xff]  ;;  %v2296_v22 = vld [vmem:[#allocation17 + $0x18] sm:$0xff] }
 0x698   : > { %v2103_v35 = vmul.f32 %v4939_v47, %v1991_v39  ;;  %v2183_v9 = vmul.f32 %v4935_v16, %v1991_v39  ;;  %v1994_v2 = vadd.f32 %v3356_v40, %v4960_v5  ;;  %v1985_v10 = vpop.f32.mrb[11].mxu1  ;;  %2313 = vmatprep.subr.bf16.mxu0 %v2279_v59  ;;  %v2263_v12 = vmul.f32 %v2231_v4, %v1991_v39 }
 0x699   : > { %v2101_v49 = vmul.f32 %v4925_v46, %v1983_v56  ;;  %v2181_v20 = vmul.f32 %v4923_v51, %v1983_v56  ;;  %v1986_v27 = vadd.f32 %v4960_v5, %v1985_v10  ;;  %v2261_v21 = vmul.f32 %v2223_v24, %v1983_v56 }
 0x69a   : > { %v2104_v33 = vmul.f32 %v4943_v18, %v1994_v2  ;;  %v2184_v47 = vmul.f32 %v4941_v23, %v1994_v2  ;;  %v2264_v16 = vmul.f32 %v4947_v52, %v1994_v2  ;;  %3368 = vmatpush3.bf16.msra.mxu1 %v2280_v44 }
 0x69b   : > { %v2102_v17 = vmul.f32 %v4929_v8, %v1986_v27  ;;  %v2182_v62 = vmul.f32 %v4937_v42, %v1986_v27  ;;  %v2262_v46 = vmul.f32 %v4931_v14, %v1986_v27  ;;  %2314 = vmatpush1.bf16.msra.mxu0 %v2278_v15  ;;  %3369 = vmatprep.subr.bf16.mxu1 %v5251_v3  ;;  %v2251_v42 = vpop.permute.xlu1 %2250  ;;  %v2247_v14 = vpop.permute.xlu0 %2246 }
 0x69c   : > { %v2284_v51 = vpack.c.bf16 %v2104_v33, %v2103_v35  ;;  %v2286_v63 = vpack.c.bf16 %v2264_v16, %v2263_v12  ;;  %v2285_v13 = vpack.c.bf16 %v2184_v47, %v2183_v9 }
 0x69d   : > { %v2281_v24 = vpack.c.bf16 %v2102_v17, %v2101_v49  ;;  %v2283_v53 = vpack.c.bf16 %v2262_v46, %v2261_v21  ;;  %v3359_v18 = vpop.f32.mrb[12].mxu1  ;;  %v2282_v55 = vpack.c.bf16 %v2182_v62, %v2181_v20 }
 0x69e   : > { %v2007_v23 = vadd.f32 %v3359_v18, %v4960_v5  ;;  %v1998_v52 = vpop.f32.mrb[13].mxu1 }
 0x69f   : > { %v1999_v50 = vadd.f32 %v4960_v5, %v1998_v52  ;;  %v3360_v8 = vpop.f32.mrb[14].mxu1  ;;  %2315 = vmatprep.subr.bf16.mxu0 %v2282_v55  ;;  %3370 = vmatpush3.bf16.msra.mxu1 %v2283_v53 }
 0x6a0   : > { %v2107_v38 = vmul.f32 %v2086_v28, %v2007_v23  ;;  %v2010_v43 = vadd.f32 %v3360_v8, %v4960_v5  ;;  %v2001_v37 = vpop.f32.mrb[15].mxu1  ;;  %2316 = vmatpush1.bf16.msra.mxu0 %v2281_v24  ;;  %v2187_v45 = vmul.f32 %v4969_v54, %v2007_v23  ;;  %v2267_v34 = vmul.f32 %v2247_v14, %v2007_v23 }
 0x6a1   : > { %v2105_v48 = vmul.f32 %v4953_v61, %v1999_v50  ;;  %v2002_v6 = vadd.f32 %v4960_v5, %v2001_v37  ;;  %2317 = vmatprep.subr.bf16.mxu0 %v2285_v13  ;;  %v2185_v36 = vmul.f32 %v4951_v0, %v1999_v50  ;;  %3371 = vmatprep.subr.bf16.mxu1 %v5251_v3 }
 0x6a2   : > { %v2108_v60 = vmul.f32 %v2091_v7, %v2010_v43  ;;  %v2188_v19 = vmul.f32 %v4949_v25, %v2010_v43  ;;  %v2268_v58 = vmul.f32 %v2251_v42, %v2010_v43  ;;  %v2265_v26 = vmul.f32 %v2239_v11, %v1999_v50 }
 0x6a3   : > { %v2106_v15 = vmul.f32 %v4955_v1, %v2002_v6  ;;  %v2186_v44 = vmul.f32 %v4945_v29, %v2002_v6  ;;  %v2266_v61 = vmul.f32 %v4965_v57, %v2002_v6  ;;  %3372 = vmatpush3.bf16.msra.mxu1 %v2286_v63  ;;  %v3733_v29 = vld [vmem:[%s5252_s6] sm:$0xff]   ;;  %v2293_v1 = vld [vmem:[#allocation17] sm:$0xff] }
 0x6a4   : > { %v2290_v5 = vpack.c.bf16 %v2108_v60, %v2107_v38  ;;  %v2292_v54 = vpack.c.bf16 %v2268_v58, %v2267_v34  ;;  %2318 = vmatpush1.bf16.msra.mxu0 %v2284_v51  ;;  %3373 = vmatprep.subr.bf16.mxu1 %v5251_v3  ;;  %v2291_v0 = vpack.c.bf16 %v2188_v19, %v2187_v45  ;;  %v2295_v57 = vld [vmem:[#allocation17 + $0x10] sm:$0xff] }
 0x6a5   : > { %v2287_v28 = vpack.c.bf16 %v2106_v15, %v2105_v48  ;;  %v2289_v25 = vpack.c.bf16 %v2266_v61, %v2265_v26  ;;  %v2288_v59 = vpack.c.bf16 %v2186_v44, %v2185_v36 }
 0x6a7   : > { %2319 = vmatprep.subr.bf16.mxu0 %v2288_v59  ;;  %3374 = vmatpush3.bf16.msra.mxu1 %v2289_v25 }
 0x6a8   : > { %2320 = vmatpush1.bf16.msra.mxu0 %v2287_v28  ;;  %3375 = vmatprep.subr.bf16.mxu1 %v5251_v3  ;;  %v2297_v3 = vld [vmem:[#allocation17 + $0x20] sm:$0xff] }
 0x6a9   : > { %2321 = vmatprep.subr.bf16.mxu0 %v2291_v0 }
 0x6ab   : > { %3376 = vmatpush3.bf16.msra.mxu1 %v2292_v54 }
 0x6ac   : > { %2322 = vmatpush1.bf16.msra.mxu0 %v2290_v5 }
 0x6ae   : > { %3378 = vmatmul.mubr.bf16.vlgmr.msra.gmra.mrb[16].mxu1 %v3733_v29 }
 0x6af   : > { %2340 = vmatmul.mubr.bf16.vlgmr.msra.gmra.mrb[16].mxu0 %v3733_v29 }
 0x781   : > { %v2384_v4 = vpop.f32.mrb[16].mxu1 }
 0x782   : > { %v2393_v41 = vadd.f32 %v2384_v4, %v2295_v57  ;;  %v2341_v32 = vpop.f32.mrb[16].mxu0  ;;  %v3379_v39 = vpop.f32.mrb[17].mxu1 }
 0x783   : > { %v2391_v56 = vadd.f32 %v2341_v32, %v2293_v1  ;;  %v2343_v40 = vpop.f32.mrb[17].mxu0  ;;  %v2387_v35 = vpop.f32.mrb[18].mxu1 }
 0x784   : > { %2399 = vst [vmem:[#allocation17 + $0x10] sm:$0xff] %v2393_v41  ;;  %v2392_v9 = vadd.f32 %v2343_v40, %v2294_v30  ;;  %v2396_v2 = vadd.f32 %v2387_v35, %v2298_v31  ;;  %v2345_v10 = vpop.f32.mrb[18].mxu0  ;;  %v3380_v12 = vpop.f32.mrb[19].mxu1 }
 0x785   : > { %2397 = vst [vmem:[#allocation17] sm:$0xff] %v2391_v56  ;;  %v2394_v49 = vadd.f32 %v2345_v10, %v2296_v22  ;;  %v2347_v20 = vpop.f32.mrb[19].mxu0 }
 0x786   : > { %2398 = vst [vmem:[#allocation17 + $0x8] sm:$0xff] %v2392_v9  ;;  %2402 = vst [vmem:[#allocation17 + $0x28] sm:$0xff] %v2396_v2  ;;  %v2395_v27 = vadd.f32 %v2347_v20, %v2297_v3 }
 0x787   : > { %2400 = vst [vmem:[#allocation17 + $0x18] sm:$0xff] %v2394_v49 }
 0x788   : > { %2401 = vst [vmem:[#allocation17 + $0x20] sm:$0xff] %v2395_v27 }
 0x789 PF: > { %2405 = sbr.rel (%p772_p12) target bundleno = 2180 (0x884), region = 144  ;;  %v5253_v7 = vld [vmem:[#allocation24_spill] sm:$0xff] (!%p772_p12)  ;;  %v5254_v11 = vld [vmem:[#allocation26_spill] sm:$0xff] (!%p772_p12)  ;;  %v4159_v33 = vmov (!%p772_p12), 0.0   ;;  %v5255_v47 = vld [vmem:[#allocation23_spill] sm:$0xff] (!%p772_p12)  ;;  %vm4160_vm6 = vmmov (!%p772_p12), 0  }
 0x78a   : > { %v2410_v21 = vpack.c.bf16 (!%p772_p12), %v5254_v11, %v5253_v7  ;;  %3381 = vmatprep.subr.bf16.mxu0 (!%p772_p12), %v4159_v33  ;;  %v5256_v16 = vld [vmem:[#allocation25_spill] sm:$0xff] (!%p772_p12)  ;;  %3397 = vmatprep.mubr.msk.bf16.mxu0 (!%p772_p12), %vm4160_vm6, %v4159_v33  ;;  %v5257_v62 = vld [vmem:[#allocation28_spill] sm:$0xff] (!%p772_p12)  ;;  %v5258_v46 = vld [vmem:[#allocation30_spill] sm:$0xff] (!%p772_p12)  ;;  %s5269_s4 = scalar_lea.vmem (!%p772_p12), [#allocation5], %s4543_s0 }
 0x78b   : > { %v2411_v17 = vpack.c.bf16 (!%p772_p12), %v5256_v16, %v5255_v47  ;;  %v2412_v51 = vpack.c.bf16 (!%p772_p12), %v5258_v46, %v5257_v62  ;;  %v5259_v63 = vld [vmem:[#allocation27_spill] sm:$0xff] (!%p772_p12)  ;;  %v5260_v13 = vld [vmem:[#allocation29_spill] sm:$0xff] (!%p772_p12)  ;;  %v5261_v53 = vld [vmem:[#allocation32_spill] sm:$0xff] (!%p772_p12) }
 0x78c   : > { %3382 = vmatpush3.bf16.msra.mxu0 (!%p772_p12), %v2410_v21  ;;  %v2413_v24 = vpack.c.bf16 (!%p772_p12), %v5260_v13, %v5259_v63  ;;  %v5262_v18 = vld [vmem:[#allocation34_spill] sm:$0xff] (!%p772_p12)  ;;  %v5263_v23 = vld [vmem:[#allocation31_spill] sm:$0xff] (!%p772_p12)  ;;  %v5264_v52 = vld [vmem:[#allocation33_spill] sm:$0xff] (!%p772_p12) }
 0x78d   : > { %3383 = vmatprep.subr.bf16.mxu0 (!%p772_p12), %v4159_v33  ;;  %v2414_v55 = vpack.c.bf16 (!%p772_p12), %v5262_v18, %v5261_v53  ;;  %v2415_v50 = vpack.c.bf16 (!%p772_p12), %v5264_v52, %v5263_v23  ;;  %v5265_v8 = vld [vmem:[#allocation36_spill] sm:$0xff] (!%p772_p12)  ;;  %v5267_v38 = vld [vmem:[#allocation35_spill] sm:$0xff] (!%p772_p12)  ;;  %v2407_v34 = vld [vmem:[#allocation4 + $0x8] sm:$0xff] (!%p772_p12) }
 0x78e   : > { %v5268_v43 = vld [vmem:[#allocation37_spill] sm:$0xff] (!%p772_p12)  ;;  %v3798_v45 = vld [vmem:[%s5269_s4] sm:$0xff] (!%p772_p12)  }
 0x78f   : > { %v5266_v42 = vld [vmem:[#allocation38_spill] sm:$0xff] (!%p772_p12)  ;;  %v2417_v37 = vpack.c.bf16 (!%p772_p12), %v5268_v43, %v5267_v38  ;;  %v2406_v48 = vld [vmem:[#allocation4] sm:$0xff] (!%p772_p12) }
 0x790   : > { %3384 = vmatpush3.bf16.msra.mxu0 %v2411_v17  ;;  %v2416_v14 = vpack.c.bf16 %v5266_v42, %v5265_v8 }
 0x791   : > { %3385 = vmatprep.subr.bf16.mxu0 %v4159_v33 }
 0x794   : > { %3386 = vmatpush3.bf16.msra.mxu0 %v2412_v51 }
 0x795   : > { %3387 = vmatprep.subr.bf16.mxu0 %v4159_v33 }
 0x798   : > { %3388 = vmatpush3.bf16.msra.mxu0 %v2413_v24 }
 0x799   : > { %3389 = vmatprep.subr.bf16.mxu0 %v4159_v33 }
 0x79c   : > { %3390 = vmatpush3.bf16.msra.mxu0 %v2414_v55 }
 0x79d   : > { %3391 = vmatprep.subr.bf16.mxu0 %v4159_v33 }
 0x7a0   : > { %3392 = vmatpush3.bf16.msra.mxu0 %v2415_v50 }
 0x7a1   : > { %3393 = vmatprep.subr.bf16.mxu0 %v4159_v33 }
 0x7a4   : > { %3394 = vmatpush3.bf16.msra.mxu0 %v2416_v14 }
 0x7a5   : > { %3395 = vmatprep.subr.bf16.mxu0 %v4159_v33 }
 0x7a8   : > { %3396 = vmatpush3.bf16.msra.mxu0 %v2417_v37 }
 0x7ab   : > { %3398 = vmatmul.mubr.bf16.vlgmr.msra.gmra.mrb[0].mxu0 %v3798_v45 }
 0x87e   : > { %v2458_v6 = vpop.f32.mrb[0].mxu0 }
 0x87f   : > { %v2465_v36 = vadd.f32 %v2458_v6, %v2406_v48  ;;  %v3399_v60 = vpop.f32.mrb[1].mxu0 }
 0x880   : > { %v2461_v19 = vpop.f32.mrb[2].mxu0 }
 0x881   : > { %2467 = vst [vmem:[#allocation4] sm:$0xff] %v2465_v36  ;;  %v2466_v58 = vadd.f32 %v2461_v19, %v2407_v34  ;;  %v3400_v26 = vpop.f32.mrb[3].mxu0 }
 0x883   : > { %2468 = vst [vmem:[#allocation4 + $0x8] sm:$0xff] %v2466_v58 }
 0x884 PF: > { %p2469_p4 = scmp.eq.s32.totalorder %s4121_s21, 1 }
 0x886   : > { %p2470_p6 = pnand %p2469_p4, %p773_p5 }
 0x887   : > { %s5270_s24 = sld [smem:[#allocation49_spill]] (!%p2470_p6)  ;;  %v2474_v56 = vld [vmem:[#allocation2] sm:$0xff] (!%p2470_p6)  ;;  %v5089_v40 = vld [vmem:[#allocation2 + $0x8] sm:$0xff] (!%p2470_p6)  ;;  %v4161_v9 = vmov (!%p2470_p6), 0.0   ;;  %v3817_v10 = vld [vmem:[#allocation13 + $0x10] sm:$0xff] (!%p2470_p6)   ;;  %vm4162_vm7 = vmmov (!%p2470_p6), 0  }
 0x888   : > { %2473 = sbr.rel (%p2470_p6) target bundleno = 2692 (0xa84), region = 148  ;;  %v2477_v1 = vld [vmem:[#allocation4] sm:$0xff] (!%p2470_p6)  ;;  %v2476_v35 = vpack.c.bf16 (!%p2470_p6), %v5089_v40, %v2474_v56  ;;  %3401 = vmatprep.subr.bf16.mxu1 (!%p2470_p6), %v4161_v9  ;;  %v3816_v2 = vld [vmem:[#allocation13 + $0x8] sm:$0xff] (!%p2470_p6)   ;;  %v3821_v27 = vld [vmem:[#allocation13 + $0x30] sm:$0xff] (!%p2470_p6)   ;;  %3417 = vmatprep.mubr.msk.bf16.mxu1 (!%p2470_p6), %vm4162_vm7, %v4161_v9  ;;  %s5271_s26 = sld [smem:[#allocation50_spill]] (!%p2470_p6) }
 0x889   : > { %v3815_v3 = vld [vmem:[#allocation13] sm:$0xff] (!%p2470_p6)   ;;  %v3818_v12 = vld [vmem:[#allocation13 + $0x18] sm:$0xff] (!%p2470_p6)   ;;  %v3820_v20 = vld [vmem:[#allocation13 + $0x28] sm:$0xff] (!%p2470_p6)   ;;  %s5272_s3 = sld [smem:[#allocation51_spill]] (!%p2470_p6) }
 0x88a   : > { %v2478_v4 = vld [vmem:[#allocation4 + $0x8] sm:$0xff] (!%p2470_p6)  ;;  %3402 = vmatpush3.bf16.msra.mxu1 (!%p2470_p6), %v3815_v3  ;;  %v3822_v7 = vld [vmem:[#allocation13 + $0x38] sm:$0xff] (!%p2470_p6)  }
 0x88b   : > { %v2479_v31 = vpack.c.bf16 (!%p2470_p6), %v2478_v4, %v2477_v1  ;;  %3403 = vmatprep.subr.bf16.mxu1 (!%p2470_p6), %v4161_v9  ;;  %v3819_v49 = vld [vmem:[#allocation13 + $0x20] sm:$0xff] (!%p2470_p6)  }
 0x88d   : > { %v3799_v15 = vld [vmem:[%s5270_s24 + $0x40] sm:$0xff] (!%p2470_p6)   ;;  %v3801_v61 = vld [vmem:[%s5270_s24 + $0x48] sm:$0xff] (!%p2470_p6)   ;;  %v3803_v54 = vld [vmem:[%s5270_s24 + $0x50] sm:$0xff] (!%p2470_p6)   ;;  %2647 = vmatprep.mubr.bf16.mxu0 (!%p2470_p6), %v2479_v31 }
 0x88e   : > { %v3800_v44 = vld [vmem:[%s5270_s24] sm:$0xff] (!%p2470_p6)   ;;  %3168 = vmatprep.subr.bf16.mxu0 (!%p2470_p6), %v3799_v15  ;;  %v3802_v5 = vld [vmem:[%s5270_s24 + $0x8] sm:$0xff] (!%p2470_p6)   ;;  %v3804_v0 = vld [vmem:[%s5270_s24 + $0x10] sm:$0xff] (!%p2470_p6)   ;;  %3404 = vmatpush3.bf16.msra.mxu1 (!%p2470_p6), %v3816_v2 }
 0x88f   : > { %3169 = vmatpush3.bf16.msra.mxu0 %v3800_v44  ;;  %v3805_v28 = vld [vmem:[%s5270_s24 + $0x58] sm:$0xff]   ;;  %v3807_v59 = vld [vmem:[%s5270_s24 + $0x60] sm:$0xff]   ;;  %v3809_v57 = vld [vmem:[%s5270_s24 + $0x68] sm:$0xff]   ;;  %3405 = vmatprep.subr.bf16.mxu1 %v4161_v9 }
 0x890   : > { %3170 = vmatprep.subr.bf16.mxu0 %v3801_v61  ;;  %v3806_v25 = vld [vmem:[%s5270_s24 + $0x18] sm:$0xff]   ;;  %v3808_v29 = vld [vmem:[%s5270_s24 + $0x20] sm:$0xff]   ;;  %v3810_v30 = vld [vmem:[%s5270_s24 + $0x28] sm:$0xff]  }
 0x891   : > { %v3811_v41 = vld [vmem:[%s5270_s24 + $0x70] sm:$0xff]   ;;  %v3813_v39 = vld [vmem:[%s5270_s24 + $0x78] sm:$0xff]   ;;  %v3042_v21 = vld [vmem:[%s5271_s26] ss:$0 sm:$0xff] }
 0x892   : > { %v3812_v32 = vld [vmem:[%s5270_s24 + $0x30] sm:$0xff]   ;;  %v3814_v22 = vld [vmem:[%s5270_s24 + $0x38] sm:$0xff]   ;;  %3406 = vmatpush3.bf16.msra.mxu1 %v3817_v10  ;;  %v3067_v37 = vld [vmem:[%s5272_s3] ss:$0 sm:$0xff] }
 0x893   : > { %3171 = vmatpush3.bf16.msra.mxu0 %v3802_v5  ;;  %3407 = vmatprep.subr.bf16.mxu1 %v4161_v9 }
 0x894   : > { %3172 = vmatprep.subr.bf16.mxu0 %v3803_v54 }
 0x896   : > { %3408 = vmatpush3.bf16.msra.mxu1 %v3818_v12 }
 0x897   : > { %3173 = vmatpush3.bf16.msra.mxu0 %v3804_v0  ;;  %3409 = vmatprep.subr.bf16.mxu1 %v4161_v9 }
 0x898   : > { %3174 = vmatprep.subr.bf16.mxu0 %v3805_v28 }
 0x89a   : > { %3410 = vmatpush3.bf16.msra.mxu1 %v3819_v49 }
 0x89b   : > { %3175 = vmatpush3.bf16.msra.mxu0 %v3806_v25  ;;  %3411 = vmatprep.subr.bf16.mxu1 %v4161_v9 }
 0x89c   : > { %3176 = vmatprep.subr.bf16.mxu0 %v3807_v59 }
 0x89e   : > { %3412 = vmatpush3.bf16.msra.mxu1 %v3820_v20 }
 0x89f   : > { %3177 = vmatpush3.bf16.msra.mxu0 %v3808_v29  ;;  %3413 = vmatprep.subr.bf16.mxu1 %v4161_v9 }
 0x8a0   : > { %3178 = vmatprep.subr.bf16.mxu0 %v3809_v57 }
 0x8a2   : > { %3414 = vmatpush3.bf16.msra.mxu1 %v3821_v27 }
 0x8a3   : > { %3179 = vmatpush3.bf16.msra.mxu0 %v3810_v30  ;;  %3415 = vmatprep.subr.bf16.mxu1 %v4161_v9 }
 0x8a4   : > { %3180 = vmatprep.subr.bf16.mxu0 %v3811_v41 }
 0x8a6   : > { %3416 = vmatpush3.bf16.msra.mxu1 %v3822_v7 }
 0x8a7   : > { %3181 = vmatpush3.bf16.msra.mxu0 %v3812_v32 }
 0x8a8   : > { %3182 = vmatprep.subr.bf16.mxu0 %v3813_v39 }
 0x8ab   : > { %3183 = vmatpush3.bf16.msra.mxu0 %v3814_v22 }
 0x8ae   : > { %2648 = vmatmul.mubr.bf16.vlgmr.msra.gmra.mrb[0].mxu0 %v2476_v35 }
 0x981   : > { %v3184_v11 = vpop.f32.mrb[0].mxu0 }
 0x982   : > { %v3185_v33 = vpop.f32.mrb[1].mxu0 }
 0x983   : > { %v3186_v47 = vadd.f32 %v3185_v33, %v3184_v11  ;;  %v3187_v16 = vpop.f32.mrb[2].mxu0 }
 0x984   : > { %v3188_v17 = vpop.f32.mrb[3].mxu0 }
 0x985   : > { %v2650_v62 = vadd.f32 %v3186_v47, %v3042_v21  ;;  %v3189_v46 = vadd.f32 %v3188_v17, %v3187_v16 }
 0x987   : > { %v2656_v51 = vsub.f32 0.0, %v2650_v62  ;;  %v2653_v63 = vadd.f32 %v3189_v46, %v3042_v21 }
 0x989   : > { %v2658_v13 = vmul.f32 1.442695, %v2656_v51  ;;  %v2657_v24 = vsub.f32 0.0, %v2653_v63 }
 0x98b   : > { %3823 = vpow2.f32 %v2658_v13  ;;  %v2660_v53 = vmul.f32 1.442695, %v2657_v24 }
 0x98d   : > { %3825 = vpow2.f32 %v2660_v53 }
 0x995   : > { %v3824_v18 = vpop.eup %3823 }
 0x996   : > { %v2662_v55 = vadd.f32 1.0, %v3824_v18 }
 0x997   : > { %v3826_v23 = vpop.eup %3825 }
 0x998   : > { %3827 = vrcp.f32 %v2662_v55  ;;  %v2663_v52 = vadd.f32 1.0, %v3826_v23 }
 0x99a   : > { %3829 = vrcp.f32 %v2663_v52 }
 0x9a2   : > { %v3828_v50 = vpop.eup %3827 }
 0x9a3   : > { %v2666_v42 = vmul.f32 %v3828_v50, %v2650_v62 }
 0x9a4   : > { %v3830_v8 = vpop.eup %3829 }
 0x9a5   : > { %v2667_v14 = vmul.f32 %v3830_v8, %v2653_v63 }
 0x9a7   : > { %v2668_v38 = vpack.c.bf16 %v2667_v14, %v2666_v42 }
 0x9a9   : > { %3418 = vmatmul.mubr.bf16.vlgmr.msra.gmra.mrb[0].mxu1 %v2668_v38 }
 0xa7c   : > { %v2767_v43 = vpop.f32.mrb[0].mxu1 }
 0xa7d   : > { %v2774_v45 = vadd.f32 %v2767_v43, %v2474_v56  ;;  %v3419_v48 = vpop.f32.mrb[1].mxu1 }
 0xa7e   : > { %v2770_v6 = vpop.f32.mrb[2].mxu1 }
 0xa7f   : > { %v2783_v34 = vadd.f32 %v3067_v37, %v2774_v45  ;;  %v2775_v36 = vadd.f32 %v2770_v6, %v5089_v40  ;;  %v3420_v60 = vpop.f32.mrb[3].mxu1 }
 0xa81   : > { %2785 = vst [vmem:[#allocation2] sm:$0xff] %v2783_v34  ;;  %v2784_v19 = vadd.f32 %v3067_v37, %v2775_v36 }
 0xa83   : > { %2786 = vst [vmem:[#allocation2 + $0x8] sm:$0xff] %v2784_v19 }
 0xa84 PF: > { %s5273_s7 = sadd.s32 4294967295, %s4137_s23   ;;  %s4163_s21 = smov [#allocation17]  }
 0xa85   : > { %p5101_p8 = scmp.eq.s32.totalorder %s5273_s7, 3  ;;  %s2793_s1 = sshll.u32 %s4163_s21, 4  ;;  %s2794_s1 = int_to_ptr.vmem [resolvable:$true] %s2793_s1 }
 0xa86   : > { %s4029_s25 = scalar_lea.vmem %s2794_s1, 768  ;;  %p4036_p12 = scmp.lt.s32.totalorder %s2794_s1, %s2794_s1 }
 0xa87   : > { %p4030_p9 = scmp.ne.s32.totalorder %s2794_s1, %s4029_s25  ;;  %p4037_p13 = scmp.lt.s32.totalorder %s4029_s25, %s4029_s25 }
 0xa89   : > { %p4031_p2 = pnand %p4030_p9, %p5101_p8  ;;  %p4038_p5 = por %p4037_p13, %p4036_p12 }
 0xa8b   : > { %p4032_p7 = pneg %p4031_p2 }
 0xa8d   : > { %p4039_p1 = pnand %p4038_p5, %p4032_p7 }
 0xa8f   : > { %4042 = shalt.err (!%p4039_p1)
}
 0xa90   : > { %s5275_s14 = sld [smem:[#allocation54_spill]] }
 0xa96   : > { %s4043_s6 = scalar_lea.hbm %s5275_s14, 768 }
 0xa97   : > { %p4044_p3 = scmp.ne.s32.totalorder %s5275_s14, %s4043_s6  ;;  %p4049_p0 = scmp.lt.u32.totalorder %s4043_s6, %s5275_s14 }
 0xa99   : > { %p4045_p10 = pnand %p4044_p3, %p5101_p8 }
 0xa9b   : > { %p4046_p11 = pneg %p4045_p10 }
 0xa9d   : > { %p4051_p4 = pnand %p4049_p0, %p4046_p11 }
 0xa9f   : > { %4054 = shalt.err (!%p4051_p4)
}
 0xaa0   : > { %s4164_s18 = smov 384   ;;  %s4165_s12 = smov 24  }
 0xaa1   : > { %3464 = dma.vmem_to_hbm [thread:$0]  (%p5101_p8), %s2794_s1, 768, %s5275_s14, [#allocation7], %s4164_s18, %s4164_s18, %s4165_s12  }
 0xaa2   : > { %4104 = dma.done.wait (%p5101_p8), [#allocation7], 768  }
 0xaa3   : > { %4106 = vsyncadd (%p5101_p8), [#allocation7], 4294966528 }
 0xaa4 PF: > { %s36_s23 = sadd.s32 1, %s4137_s23   ;;  %s5276_s0 = smov %s4113_s30 }
 0xaa5   : > { %p33_p6 = scmp.ge.s32.totalorder %s36_s23, 6   ;;  %s5277_s30 = smov %s4117_s20 }
 0xaa6   : > { %s5278_s20 = smov %s4487_s9  ;;  %s5279_s21 = smov %s4129_s22 }
 0xaa7   : > { %s5280_s1 = smov %s4133_s2  ;;  %s5281_s22 = smov %s5284_s10 }
 0xaa8   : > { %s5282_s2 = smov %s5288_s28  ;;  %35 = sbr.rel (!%p33_p6) target bundleno = 26 (0x1a), region = 190 }
 0xaaf   :  { %2809 = vsyncpa [#allocation6], 1 }
 0xab0   :  { %2811 = vsyncpa [#allocation6 + $0x1], 1 }
 0xab1   :  { %2812 = vsyncpa [#allocation9], 1 }
 0xab2   :  { %2813 = vsyncpa [#allocation12], 1 }
 0xab3   :  { %2814 = vsyncpa [#allocation15], 1 }
 0xab4   :  { %2815 = vsyncpa [#allocation7], 1 }
 0xab5   :  { %2817 = vsyncpa [#allocation7 + $0x1], 1 }

</bundles_post_ra>
